<compile_context>
chip_gen: v6e
topology: v6e:2x2x1
jax: 0.10.0
libtpu: 0.0.40
codegen_flags: <defaults>
</compile_context>

<pallas_src>
import functools
import math

import jax
import jax.numpy as jnp
from jax.experimental import pallas as pl
from jax.experimental.pallas import tpu as pltpu


LANE = 128
# Conservative working budget: fits v7x (64 MiB physical VMEM) and leaves
# plenty of slack on v5e/v6e (128 MiB).
VMEM_LIMIT_BYTES = 48 * 1024 * 1024
# Budget for keeping the (double-buffered) bf16 Z matrix resident in VMEM.
Z_RESIDENT_BUDGET = 24 * 1024 * 1024


def _round_up(x, m):
    return ((x + m - 1) // m) * m


def _choose_tiles(n):
    """Pick (tm, tk, Np) with tk % tm == 0 and Np = round_up(n, tk).

    Prefer big A tiles (amortize per-grid-step pipeline overhead on the
    HBM-bound adjacency stream), but never pad the O(N^2) adjacency by more
    than ~10% over minimal 128-alignment, and keep >= 2 row tiles so the
    'parallel' row axis can split across both TensorCores on v7x.
    """
    min_np = _round_up(n, LANE)
    for tm, tk in ((512, 2048), (512, 1024), (512, 512),
                   (256, 512), (256, 256), (128, 256), (128, 128)):
        np_pad = _round_up(n, tk)
        if np_pad <= min_np * 1.1 and np_pad // tm >= 2:
            return tm, tk, np_pad
    return LANE, LANE, min_np


# --------------------------------------------------------------------------
# Dense normalized adjacency (PyG gcn_norm with add_remaining_self_loops):
# self-loop weight 1.0 is only added for nodes without an explicit self loop.
# --------------------------------------------------------------------------
def build_normalized_adjacency(edge_index, edge_weight, num_nodes):
    src, dst = edge_index[0], edge_index[1]
    A = jnp.zeros((num_nodes, num_nodes), jnp.float32).at[dst, src].add(
        edge_weight)
    self_mask = (src == dst).astype(jnp.float32)
    self_count = jnp.zeros((num_nodes,), jnp.float32).at[src].add(self_mask)
    A = A + jnp.diag(jnp.where(self_count > 0, 0.0, 1.0))
    deg = jnp.sum(A, axis=1)
    dinv = jnp.where(deg > 0, 1.0 / jnp.sqrt(deg), 0.0)
    return dinv[:, None] * A * dinv[None, :]


# --------------------------------------------------------------------------
# One-time preprocessing: quantize + zero-pad A_hat (hoisted out of forward).
# Quantize BEFORE padding so no f32 Np x Np intermediate is materialized.
# --------------------------------------------------------------------------
def quantize_pad_adjacency(a_hat, n_pad):
    n = a_hat.shape[0]
    max_abs = jnp.maximum(jnp.max(jnp.abs(a_hat)), 1e-12)
    scale = 127.0 / max_abs
    a_q_small = jnp.clip(jnp.round(a_hat * scale), -127.0, 127.0).astype(
        jnp.int8)
    a_q = jnp.zeros((n_pad, n_pad), jnp.int8).at[:n, :n].set(a_q_small)
    return a_q, (1.0 / scale).astype(jnp.float32)


# --------------------------------------------------------------------------
# Shared accumulate step: int8 A tile -> bf16, MXU dot, f32 accumulate.
# Z is either VMEM-resident (slice the k-th slab) or streamed per k step.
# --------------------------------------------------------------------------
def _acc_step(a_ref, z_ref, acc_ref, k, tk, z_resident):
    # int8 values are exactly representable in bf16 (|v| <= 127).
    a_bf = a_ref[...].astype(jnp.float32).astype(jnp.bfloat16)
    if z_resident:
        start = pl.multiple_of(k * tk, tk)
        zk = z_ref[pl.ds(start, tk), :]
    else:
        zk = z_ref[...]
    acc_ref[...] += jnp.dot(a_bf, zk, preferred_element_type=jnp.float32)


# --------------------------------------------------------------------------
# Kernel 1: Z2 = bf16( relu(A_hat @ Z1 + b1) @ W2 )
#   grid = (row_tiles, k_tiles); K-reduction with f32 VMEM accumulator.
#   (dequant scale already folded into Z1 / W2 by the wrapper)
# --------------------------------------------------------------------------
def prop1_kernel(tk, z_resident, a_ref, z_ref, b1_ref, w2_ref, out_ref,
                 acc_ref):
    k = pl.program_id(1)

    @pl.when(k == 0)
    def _():
        acc_ref[...] = jnp.zeros_like(acc_ref)

    _acc_step(a_ref, z_ref, acc_ref, k, tk, z_resident)

    @pl.when(k == pl.num_programs(1) - 1)
    def _():
        h = jnp.maximum(acc_ref[...] + b1_ref[...], 0.0).astype(jnp.bfloat16)
        out_ref[...] = jnp.dot(
            h, w2_ref[...], preferred_element_type=jnp.float32
        ).astype(out_ref.dtype)


# --------------------------------------------------------------------------
# Kernel 2: OUT = log_softmax( relu(A_hat @ Z2 + b2) @ WF + bf )
#   Padded logit lanes (>= num_out) are masked to -inf before the softmax.
# --------------------------------------------------------------------------
def prop2_kernel(tk, z_resident, num_out, a_ref, z_ref, b2_ref, wf_ref,
                 bf_ref, out_ref, acc_ref):
    k = pl.program_id(1)

    @pl.when(k == 0)
    def _():
        acc_ref[...] = jnp.zeros_like(acc_ref)

    _acc_step(a_ref, z_ref, acc_ref, k, tk, z_resident)

    @pl.when(k == pl.num_programs(1) - 1)
    def _():
        h2 = jnp.maximum(acc_ref[...] + b2_ref[...], 0.0).astype(jnp.bfloat16)
        logits = jnp.dot(
            h2, wf_ref[...], preferred_element_type=jnp.float32
        ) + bf_ref[...]
        tm, op = logits.shape
        lane_id = jax.lax.broadcasted_iota(jnp.int32, (tm, op), 1)
        logits = jnp.where(lane_id < num_out, logits, jnp.float32(-1e30))
        m = jnp.max(logits, axis=1, keepdims=True)
        z = logits - m
        lse = jnp.log(jnp.sum(jnp.exp(z), axis=1, keepdims=True))
        out_ref[...] = (z - lse).astype(out_ref.dtype)


# --------------------------------------------------------------------------
# Forward pass. a_q / inv_scale come from quantize_pad_adjacency (one-time).
# --------------------------------------------------------------------------
def gcn_forward(a_q, inv_scale, x, w1, b1, w2, b2, wf, bf, *, tm, tk):
    N, F_in = x.shape
    H = w1.shape[1]
    O = wf.shape[1]
    Np = a_q.shape[0]
    assert tk % tm == 0 and Np % tk == 0, "tk must divide Np and tm must divide tk"

    Fp = _round_up(F_in, LANE)
    Hp = _round_up(H, LANE)
    Op = _round_up(O, LANE)

    # Fold the A dequant factor into the projection weights so the kernels
    # multiply the integer-valued A_q directly (no per-tile scale multiply).
    w1s = w1 * inv_scale
    w2s = w2 * inv_scale

    # Zero-padded, lane-dense operands; weights in bf16 for the MXU.
    x_p = jnp.zeros((Np, Fp), jnp.bfloat16).at[:N, :F_in].set(
        x.astype(jnp.bfloat16))
    w1_p = jnp.zeros((Fp, Hp), jnp.bfloat16).at[:F_in, :H].set(
        w1s.astype(jnp.bfloat16))
    b1_p = jnp.zeros((1, Hp), jnp.float32).at[:, :H].set(b1)
    w2_p = jnp.zeros((Hp, Hp), jnp.bfloat16).at[:H, :H].set(
        w2s.astype(jnp.bfloat16))
    b2_p = jnp.zeros((1, Hp), jnp.float32).at[:, :H].set(b2)
    wf_p = jnp.zeros((Hp, Op), jnp.bfloat16).at[:H, :O].set(
        wf.astype(jnp.bfloat16))
    bf_p = jnp.zeros((1, Op), jnp.float32).at[:, :O].set(bf)

    n_rows = Np // tm
    n_k = Np // tk

    # Z1 = bf16(X @ (W1 / s)) -- tiny (N x Fp)@(Fp x Hp); plain XLA is plenty
    # and saves one pallas_call's fixed cost.
    z1 = jnp.dot(x_p, w1_p, preferred_element_type=jnp.float32).astype(
        jnp.bfloat16)

    # Keep the whole Z matrix VMEM-resident (constant block index -> fetched
    # once) when it fits the budget; otherwise fall back to streaming slabs.
    z_resident = 2 * Np * Hp * 2 <= Z_RESIDENT_BUDGET
    if z_resident:
        z_spec = pl.BlockSpec((Np, Hp), lambda i, k: (0, 0))
    else:
        z_spec = pl.BlockSpec((tk, Hp), lambda i, k: (k, 0))

    a_spec = pl.BlockSpec((tm, tk), lambda i, k: (i, k))

    def const_spec(shape):
        return pl.BlockSpec(shape, lambda i, k: (0, 0))

    cparams = pltpu.CompilerParams(
        dimension_semantics=("parallel", "arbitrary"),
        vmem_limit_bytes=VMEM_LIMIT_BYTES)

    # --- Z2 = bf16( relu(A_q @ Z1 + b1) @ (W2/s) ) --------------------------
    z2 = pl.pallas_call(
        functools.partial(prop1_kernel, tk, z_resident),
        out_shape=jax.ShapeDtypeStruct((Np, Hp), jnp.bfloat16),
        grid=(n_rows, n_k),
        in_specs=[a_spec, z_spec, const_spec((1, Hp)), const_spec((Hp, Hp))],
        out_specs=pl.BlockSpec((tm, Hp), lambda i, k: (i, 0)),
        scratch_shapes=[pltpu.VMEM((tm, Hp), jnp.float32)],
        compiler_params=cparams,
    )(a_q, z1, b1_p, w2_p)

    # --- OUT = log_softmax( relu(A_q @ Z2 + b2) @ WF + bf ) -----------------
    out_p = pl.pallas_call(
        functools.partial(prop2_kernel, tk, z_resident, O),
        out_shape=jax.ShapeDtypeStruct((Np, Op), jnp.float32),
        grid=(n_rows, n_k),
        in_specs=[a_spec, z_spec, const_spec((1, Hp)), const_spec((Hp, Op)),
                  const_spec((1, Op))],
        out_specs=pl.BlockSpec((tm, Op), lambda i, k: (i, 0)),
        scratch_shapes=[pltpu.VMEM((tm, Op), jnp.float32)],
        compiler_params=cparams,
    )(a_q, z2, b2_p, wf_p, bf_p)

    return out_p[:N, :O]


# --------------------------------------------------------------------------
# Pure-JAX reference mirroring the kernel's int8-A + bf16 casts (validation).
# --------------------------------------------------------------------------
def gcn_reference(a_q, inv_scale, x, w1, b1, w2, b2, wf, bf):
    n = x.shape[0]
    a_bf = a_q[:n, :n].astype(jnp.bfloat16)          # integer-valued
    w1s = (w1 * inv_scale).astype(jnp.bfloat16)
    w2s = (w2 * inv_scale).astype(jnp.bfloat16)
    z1 = jnp.dot(x.astype(jnp.bfloat16), w1s,
                 preferred_element_type=jnp.float32).astype(jnp.bfloat16)
    h1 = jnp.maximum(
        jnp.dot(a_bf, z1, preferred_element_type=jnp.float32) + b1, 0.0)
    z2 = jnp.dot(h1.astype(jnp.bfloat16), w2s,
                 preferred_element_type=jnp.float32).astype(jnp.bfloat16)
    h2 = jnp.maximum(
        jnp.dot(a_bf, z2, preferred_element_type=jnp.float32) + b2, 0.0)
    logits = jnp.dot(h2.astype(jnp.bfloat16), wf.astype(jnp.bfloat16),
                     preferred_element_type=jnp.float32) + bf
    return jax.nn.log_softmax(logits, axis=1)


if __name__ == "__main__":
    # Small synthetic graph consistent with GCN(input_dim, hidden_dim, output_dim)
    N = 520        # nodes (non-multiple of tile sizes -> exercises padding path)
    F_in = 8       # input_dim
    H = 32         # hidden_dim
    O = 7          # output_dim
    E = 2048       # edges

    key = jax.random.PRNGKey(0)
    kx, ke, kw, kw1, kw2, kwf, kbf = jax.random.split(key, 7)

    x = jax.random.normal(kx, (N, F_in), jnp.float32)
    edge_index = jax.random.randint(ke, (2, E), 0, N, jnp.int32)
    edge_weight = jax.random.uniform(kw, (E,), jnp.float32, 0.1, 1.0)

    w1 = jax.random.normal(kw1, (F_in, H), jnp.float32) * (1.0 / math.sqrt(F_in))
    b1 = jnp.zeros((1, H), jnp.float32)
    w2 = jax.random.normal(kw2, (H, H), jnp.float32) * (1.0 / math.sqrt(H))
    b2 = jnp.zeros((1, H), jnp.float32)
    wf = jax.random.normal(kwf, (H, O), jnp.float32) * (1.0 / math.sqrt(H))
    bf = jax.random.normal(kbf, (1, O), jnp.float32) * 0.01

    a_hat = build_normalized_adjacency(edge_index, edge_weight, N)

    # One-time preprocessing (hoisted out of the forward): tile choice,
    # padding and int8 quantization of the dense normalized adjacency.
    tm, tk, Np = _choose_tiles(N)
    a_q, inv_scale = quantize_pad_adjacency(a_hat, Np)
    a_q = jax.block_until_ready(a_q)

    fwd = jax.jit(functools.partial(gcn_forward, tm=tm, tk=tk))
    out = jax.block_until_ready(fwd(a_q, inv_scale, x, w1, b1, w2, b2, wf, bf))
    assert out.shape == (N, O)

    # Rows of log_softmax must exponentiate-and-sum to 1.
    row_sums = jnp.sum(jnp.exp(out), axis=1)
    assert bool(jnp.all(jnp.abs(row_sums - 1.0) < 1e-3))

    # Cross-check against the pure-JAX reference with matching quantization.
    ref = gcn_reference(a_q, inv_scale, x, w1, b1, w2, b2, wf, bf)
    assert bool(jnp.allclose(out, ref, atol=5e-2, rtol=5e-2))

    print("KERNEL_OK")
</pallas_src>

<mosaic_0001>
module attributes {stable_mosaic.version = 11 : i64} {
  func.func @prop1_kernel(%arg0: i32, %arg1: i32, %arg2: memref<128x128xi8, #tpu.memory_space<vmem>>, %arg3: memref<640x128xbf16, #tpu.memory_space<vmem>>, %arg4: memref<1x128xf32, #tpu.memory_space<vmem>>, %arg5: memref<128x128xbf16, #tpu.memory_space<vmem>>, %arg6: memref<128x128xbf16, #tpu.memory_space<vmem>>, %arg7: memref<128x128xf32, #tpu.memory_space<vmem>>) attributes {dimension_semantics = [#tpu.dimension_semantics<parallel>, #tpu.dimension_semantics<arbitrary>], iteration_bounds = array<i64: 5, 5>, scalar_prefetch = 0 : i64, scratch_operands = 1 : i64, tpu.core_type = #tpu.core_type<tc>, window_params = [{transform_indices = @transform_0, window_bounds = array<i64: 128, 128>}, {pipeline_mode = #tpu.pipeline_mode<synchronous>, transform_indices = @transform_1, window_bounds = array<i64: 640, 128>}, {pipeline_mode = #tpu.pipeline_mode<synchronous>, transform_indices = @transform_2, window_bounds = array<i64: 1, 128>}, {pipeline_mode = #tpu.pipeline_mode<synchronous>, transform_indices = @transform_3, window_bounds = array<i64: 128, 128>}, {transform_indices = @transform_4, window_bounds = array<i64: 128, 128>}]} {
    %c0_i32 = arith.constant 0 : i32
    %0 = arith.cmpi eq, %arg1, %c0_i32 : i32
    %1 = arith.extui %0 : i1 to i32
    %c0_i32_0 = arith.constant 0 : i32
    %2 = arith.cmpi ne, %1, %c0_i32_0 : i32
    scf.if %2 {
      %cst_8 = arith.constant 0.000000e+00 : f32
      %17 = vector.broadcast %cst_8 : f32 to vector<128x128xf32>
      %c0_9 = arith.constant 0 : index
      %c0_10 = arith.constant 0 : index
      %18 = vector.load %arg7[%c0_9, %c0_10] : memref<128x128xf32, #tpu.memory_space<vmem>>, vector<128x128xf32>
      tpu.vector_store %arg7[%c0_9, %c0_10], %17 {strides = array<i32>} : memref<128x128xf32, #tpu.memory_space<vmem>>, vector<128x128xf32>,
    } else {
    }
    %c0 = arith.constant 0 : index
    %c0_1 = arith.constant 0 : index
    %3 = vector.load %arg2[%c0, %c0_1] : memref<128x128xi8, #tpu.memory_space<vmem>>, vector<128x128xi8>
    %4 = arith.sitofp %3 : vector<128x128xi8> to vector<128x128xf32>
    %5 = arith.truncf %4 : vector<128x128xf32> to vector<128x128xbf16>
    %c128_i32 = arith.constant 128 : i32
    %6 = arith.muli %arg1, %c128_i32 : i32
    %7 = tpu.assume_multiple %6, 128 : i32
    %8 = arith.index_cast %7 : i32 to index
    %c0_2 = arith.constant 0 : index
    %9 = vector.load %arg3[%8, %c0_2] : memref<640x128xbf16, #tpu.memory_space<vmem>>, vector<128x128xbf16>
    %c0_3 = arith.constant 0 : index
    %c0_4 = arith.constant 0 : index
    %10 = vector.load %arg7[%c0_3, %c0_4] : memref<128x128xf32, #tpu.memory_space<vmem>>, vector<128x128xf32>
    %cst = arith.constant dense<0.000000e+00> : vector<128x128xf32>
    %11 = tpu.matmul %5, %9, %cst {dimension_numbers = #tpu.dot_dimension_numbers<[1], [0], [0], [1], [0, 0, 1, 1], [], []>} : vector<128x128xbf16>, vector<128x128xbf16>, vector<128x128xf32> -> vector<128x128xf32>
    %12 = arith.addf %10, %11 : vector<128x128xf32>
    %c0_5 = arith.constant 0 : index
    %c0_6 = arith.constant 0 : index
    %13 = vector.load %arg7[%c0_5, %c0_6] : memref<128x128xf32, #tpu.memory_space<vmem>>, vector<128x128xf32>
    tpu.vector_store %arg7[%c0_5, %c0_6], %12 {strides = array<i32>} : memref<128x128xf32, #tpu.memory_space<vmem>>, vector<128x128xf32>,
    %c4_i32 = arith.constant 4 : i32
    %14 = arith.cmpi eq, %arg1, %c4_i32 : i32
    %15 = arith.extui %14 : i1 to i32
    %c0_i32_7 = arith.constant 0 : i32
    %16 = arith.cmpi ne, %15, %c0_i32_7 : i32
    scf.if %16 {
      %c0_8 = arith.constant 0 : index
      %c0_9 = arith.constant 0 : index
      %17 = vector.load %arg7[%c0_8, %c0_9] : memref<128x128xf32, #tpu.memory_space<vmem>>, vector<128x128xf32>
      %c0_10 = arith.constant 0 : index
      %c0_11 = arith.constant 0 : index
      %18 = vector.load %arg4[%c0_10, %c0_11] : memref<1x128xf32, #tpu.memory_space<vmem>>, vector<1x128xf32>
      %19 = vector.broadcast %18 : vector<1x128xf32> to vector<128x128xf32>
      %20 = arith.addf %17, %19 : vector<128x128xf32>
      %cst_12 = arith.constant 0.000000e+00 : f32
      %21 = vector.broadcast %cst_12 : f32 to vector<128x128xf32>
      %22 = arith.maximumf %20, %21 : vector<128x128xf32>
      %23 = arith.truncf %22 : vector<128x128xf32> to vector<128x128xbf16>
      %c0_13 = arith.constant 0 : index
      %c0_14 = arith.constant 0 : index
      %24 = vector.load %arg5[%c0_13, %c0_14] : memref<128x128xbf16, #tpu.memory_space<vmem>>, vector<128x128xbf16>
      %cst_15 = arith.constant dense<0.000000e+00> : vector<128x128xf32>
      %25 = tpu.matmul %23, %24, %cst_15 {dimension_numbers = #tpu.dot_dimension_numbers<[1], [0], [0], [1], [0, 0, 1, 1], [], []>} : vector<128x128xbf16>, vector<128x128xbf16>, vector<128x128xf32> -> vector<128x128xf32>
      %26 = arith.truncf %25 : vector<128x128xf32> to vector<128x128xbf16>
      %c0_16 = arith.constant 0 : index
      %c0_17 = arith.constant 0 : index
      %27 = vector.load %arg6[%c0_16, %c0_17] : memref<128x128xbf16, #tpu.memory_space<vmem>>, vector<128x128xbf16>
      tpu.vector_store %arg6[%c0_16, %c0_17], %26 {strides = array<i32>} : memref<128x128xbf16, #tpu.memory_space<vmem>>, vector<128x128xbf16>,
    } else {
    }
    return
  }
  func.func @transform_0(%arg0: i32, %arg1: i32) -> (i32, i32) {
    %c0_i32 = arith.constant 0 : i32
    return %arg0, %arg1 : i32, i32
  }
  func.func @transform_1(%arg0: i32, %arg1: i32) -> (i32, i32) {
    %c0_i32 = arith.constant 0 : i32
    %c0_i32_0 = arith.constant 0 : i32
    %c0_i32_1 = arith.constant 0 : i32
    return %c0_i32, %c0_i32_0 : i32, i32
  }
  func.func @transform_2(%arg0: i32, %arg1: i32) -> (i32, i32) {
    %c0_i32 = arith.constant 0 : i32
    %c0_i32_0 = arith.constant 0 : i32
    %c0_i32_1 = arith.constant 0 : i32
    return %c0_i32, %c0_i32_0 : i32, i32
  }
  func.func @transform_3(%arg0: i32, %arg1: i32) -> (i32, i32) {
    %c0_i32 = arith.constant 0 : i32
    %c0_i32_0 = arith.constant 0 : i32
    %c0_i32_1 = arith.constant 0 : i32
    return %c0_i32, %c0_i32_0 : i32, i32
  }
  func.func @transform_4(%arg0: i32, %arg1: i32) -> (i32, i32) {
    %c0_i32 = arith.constant 0 : i32
    %c0_i32_0 = arith.constant 0 : i32
    return %arg0, %c0_i32 : i32, i32
  }
}

module attributes {stable_mosaic.version = 11 : i64} {
  func.func @prop2_kernel(%arg0: i32, %arg1: i32, %arg2: memref<128x128xi8, #tpu.memory_space<vmem>>, %arg3: memref<640x128xbf16, #tpu.memory_space<vmem>>, %arg4: memref<1x128xf32, #tpu.memory_space<vmem>>, %arg5: memref<128x128xbf16, #tpu.memory_space<vmem>>, %arg6: memref<1x128xf32, #tpu.memory_space<vmem>>, %arg7: memref<128x128xf32, #tpu.memory_space<vmem>>, %arg8: memref<128x128xf32, #tpu.memory_space<vmem>>) attributes {dimension_semantics = [#tpu.dimension_semantics<parallel>, #tpu.dimension_semantics<arbitrary>], iteration_bounds = array<i64: 5, 5>, scalar_prefetch = 0 : i64, scratch_operands = 1 : i64, tpu.core_type = #tpu.core_type<tc>, window_params = [{transform_indices = @transform_0, window_bounds = array<i64: 128, 128>}, {pipeline_mode = #tpu.pipeline_mode<synchronous>, transform_indices = @transform_1, window_bounds = array<i64: 640, 128>}, {pipeline_mode = #tpu.pipeline_mode<synchronous>, transform_indices = @transform_2, window_bounds = array<i64: 1, 128>}, {pipeline_mode = #tpu.pipeline_mode<synchronous>, transform_indices = @transform_3, window_bounds = array<i64: 128, 128>}, {pipeline_mode = #tpu.pipeline_mode<synchronous>, transform_indices = @transform_4, window_bounds = array<i64: 1, 128>}, {transform_indices = @transform_5, window_bounds = array<i64: 128, 128>}]} {
    %c0_i32 = arith.constant 0 : i32
    %0 = arith.cmpi eq, %arg1, %c0_i32 : i32
    %1 = arith.extui %0 : i1 to i32
    %c0_i32_0 = arith.constant 0 : i32
    %2 = arith.cmpi ne, %1, %c0_i32_0 : i32
    scf.if %2 {
      %cst_8 = arith.constant 0.000000e+00 : f32
      %17 = vector.broadcast %cst_8 : f32 to vector<128x128xf32>
      %c0_9 = arith.constant 0 : index
      %c0_10 = arith.constant 0 : index
      %18 = vector.load %arg8[%c0_9, %c0_10] : memref<128x128xf32, #tpu.memory_space<vmem>>, vector<128x128xf32>
      tpu.vector_store %arg8[%c0_9, %c0_10], %17 {strides = array<i32>} : memref<128x128xf32, #tpu.memory_space<vmem>>, vector<128x128xf32>,
    } else {
    }
    %c0 = arith.constant 0 : index
    %c0_1 = arith.constant 0 : index
    %3 = vector.load %arg2[%c0, %c0_1] : memref<128x128xi8, #tpu.memory_space<vmem>>, vector<128x128xi8>
    %4 = arith.sitofp %3 : vector<128x128xi8> to vector<128x128xf32>
    %5 = arith.truncf %4 : vector<128x128xf32> to vector<128x128xbf16>
    %c128_i32 = arith.constant 128 : i32
    %6 = arith.muli %arg1, %c128_i32 : i32
    %7 = tpu.assume_multiple %6, 128 : i32
    %8 = arith.index_cast %7 : i32 to index
    %c0_2 = arith.constant 0 : index
    %9 = vector.load %arg3[%8, %c0_2] : memref<640x128xbf16, #tpu.memory_space<vmem>>, vector<128x128xbf16>
    %c0_3 = arith.constant 0 : index
    %c0_4 = arith.constant 0 : index
    %10 = vector.load %arg8[%c0_3, %c0_4] : memref<128x128xf32, #tpu.memory_space<vmem>>, vector<128x128xf32>
    %cst = arith.constant dense<0.000000e+00> : vector<128x128xf32>
    %11 = tpu.matmul %5, %9, %cst {dimension_numbers = #tpu.dot_dimension_numbers<[1], [0], [0], [1], [0, 0, 1, 1], [], []>} : vector<128x128xbf16>, vector<128x128xbf16>, vector<128x128xf32> -> vector<128x128xf32>
    %12 = arith.addf %10, %11 : vector<128x128xf32>
    %c0_5 = arith.constant 0 : index
    %c0_6 = arith.constant 0 : index
    %13 = vector.load %arg8[%c0_5, %c0_6] : memref<128x128xf32, #tpu.memory_space<vmem>>, vector<128x128xf32>
    tpu.vector_store %arg8[%c0_5, %c0_6], %12 {strides = array<i32>} : memref<128x128xf32, #tpu.memory_space<vmem>>, vector<128x128xf32>,
    %c4_i32 = arith.constant 4 : i32
    %14 = arith.cmpi eq, %arg1, %c4_i32 : i32
    %15 = arith.extui %14 : i1 to i32
    %c0_i32_7 = arith.constant 0 : i32
    %16 = arith.cmpi ne, %15, %c0_i32_7 : i32
    scf.if %16 {
      %c0_8 = arith.constant 0 : index
      %c0_9 = arith.constant 0 : index
      %17 = vector.load %arg8[%c0_8, %c0_9] : memref<128x128xf32, #tpu.memory_space<vmem>>, vector<128x128xf32>
      %c0_10 = arith.constant 0 : index
      %c0_11 = arith.constant 0 : index
      %18 = vector.load %arg4[%c0_10, %c0_11] : memref<1x128xf32, #tpu.memory_space<vmem>>, vector<1x128xf32>
      %19 = vector.broadcast %18 : vector<1x128xf32> to vector<128x128xf32>
      %20 = arith.addf %17, %19 : vector<128x128xf32>
      %cst_12 = arith.constant 0.000000e+00 : f32
      %21 = vector.broadcast %cst_12 : f32 to vector<128x128xf32>
      %22 = arith.maximumf %20, %21 : vector<128x128xf32>
      %23 = arith.truncf %22 : vector<128x128xf32> to vector<128x128xbf16>
      %c0_13 = arith.constant 0 : index
      %c0_14 = arith.constant 0 : index
      %24 = vector.load %arg5[%c0_13, %c0_14] : memref<128x128xbf16, #tpu.memory_space<vmem>>, vector<128x128xbf16>
      %cst_15 = arith.constant dense<0.000000e+00> : vector<128x128xf32>
      %25 = tpu.matmul %23, %24, %cst_15 {dimension_numbers = #tpu.dot_dimension_numbers<[1], [0], [0], [1], [0, 0, 1, 1], [], []>} : vector<128x128xbf16>, vector<128x128xbf16>, vector<128x128xf32> -> vector<128x128xf32>
      %c0_16 = arith.constant 0 : index
      %c0_17 = arith.constant 0 : index
      %26 = vector.load %arg6[%c0_16, %c0_17] : memref<1x128xf32, #tpu.memory_space<vmem>>, vector<1x128xf32>
      %27 = vector.broadcast %26 : vector<1x128xf32> to vector<128x128xf32>
      %28 = arith.addf %25, %27 : vector<128x128xf32>
      %29 = tpu.iota {dimensions = array<i32: 1>} : vector<128x128xi32>
      %c7_i32 = arith.constant 7 : i32
      %30 = vector.broadcast %c7_i32 : i32 to vector<128x128xi32>
      %31 = arith.cmpi slt, %29, %30 : vector<128x128xi32>
      %cst_18 = arith.constant -1.000000e+30 : f32
      %32 = vector.broadcast %cst_18 : f32 to vector<128x128xf32>
      %33 = arith.select %31, %28, %32 : vector<128x128xi1>, vector<128x128xf32>
      %cst_19 = arith.constant dense<0xFF800000> : vector<128xf32>
      %34 = vector.multi_reduction <maximumf>, %33, %cst_19 [1] : vector<128x128xf32> to vector<128xf32>
      %35 = vector.shape_cast %34 : vector<128xf32> to vector<128x1xf32>
      %36 = vector.broadcast %35 : vector<128x1xf32> to vector<128x128xf32>
      %37 = arith.subf %33, %36 : vector<128x128xf32>
      %38 = math.exp %37 : vector<128x128xf32>
      %cst_20 = arith.constant dense<0.000000e+00> : vector<128xf32>
      %39 = vector.multi_reduction <add>, %38, %cst_20 [1] : vector<128x128xf32> to vector<128xf32>
      %40 = vector.shape_cast %39 : vector<128xf32> to vector<128x1xf32>
      %41 = math.log %40 : vector<128x1xf32>
      %42 = vector.broadcast %41 : vector<128x1xf32> to vector<128x128xf32>
      %43 = arith.subf %37, %42 : vector<128x128xf32>
      %c0_21 = arith.constant 0 : index
      %c0_22 = arith.constant 0 : index
      %44 = vector.load %arg7[%c0_21, %c0_22] : memref<128x128xf32, #tpu.memory_space<vmem>>, vector<128x128xf32>
      tpu.vector_store %arg7[%c0_21, %c0_22], %43 {strides = array<i32>} : memref<128x128xf32, #tpu.memory_space<vmem>>, vector<128x128xf32>,
    } else {
    }
    return
  }
  func.func @transform_0(%arg0: i32, %arg1: i32) -> (i32, i32) {
    %c0_i32 = arith.constant 0 : i32
    return %arg0, %arg1 : i32, i32
  }
  func.func @transform_1(%arg0: i32, %arg1: i32) -> (i32, i32) {
    %c0_i32 = arith.constant 0 : i32
    %c0_i32_0 = arith.constant 0 : i32
    %c0_i32_1 = arith.constant 0 : i32
    return %c0_i32, %c0_i32_0 : i32, i32
  }
  func.func @transform_2(%arg0: i32, %arg1: i32) -> (i32, i32) {
    %c0_i32 = arith.constant 0 : i32
    %c0_i32_0 = arith.constant 0 : i32
    %c0_i32_1 = arith.constant 0 : i32
    return %c0_i32, %c0_i32_0 : i32, i32
  }
  func.func @transform_3(%arg0: i32, %arg1: i32) -> (i32, i32) {
    %c0_i32 = arith.constant 0 : i32
    %c0_i32_0 = arith.constant 0 : i32
    %c0_i32_1 = arith.constant 0 : i32
    return %c0_i32, %c0_i32_0 : i32, i32
  }
  func.func @transform_4(%arg0: i32, %arg1: i32) -> (i32, i32) {
    %c0_i32 = arith.constant 0 : i32
    %c0_i32_0 = arith.constant 0 : i32
    %c0_i32_1 = arith.constant 0 : i32
    return %c0_i32, %c0_i32_0 : i32, i32
  }
  func.func @transform_5(%arg0: i32, %arg1: i32) -> (i32, i32) {
    %c0_i32 = arith.constant 0 : i32
    %c0_i32_0 = arith.constant 0 : i32
    return %arg0, %c0_i32 : i32, i32
  }
}

</mosaic_0001>

<bundles_post_ra>
// kernel: gcn_forward.2
= control target key start
LH: loop header
LB: loop body
LE: loop exit
PB: predicated region body
PF: predicated region fallthrough
CT: control target
= control target key end

     0   :  { %9 = vsyncpa [#allocation4], 0  ;;  %s1533_s0 = inlined_call_operand.hbm [shape: s8[640,640], index: 0, kind: input, shape index: {}]   ;;  %s1534_s1 = inlined_call_operand.vmem [shape: bf16[640,128], index: 1, kind: input, shape index: {}]   ;;  %s1535_s2 = inlined_call_operand.vmem [shape: f32[1,128], index: 2, kind: input, shape index: {}]   ;;  %s1536_s3 = inlined_call_operand.vmem [shape: bf16[128,128], index: 3, kind: input, shape index: {}]   ;;  %s1537_s4 = inlined_call_operand.vmem [shape: bf16[640,128], index: 4, kind: output, shape index: {}]  }
   0x1   :  { %11 = vsyncpa [#allocation4 + $0x1], 0  ;;  %s1334_s15 = smov 0   ;;  %s1336_s16 = smov 0  }
   0x2   :  { %s1338_s17 = smov 0   ;;  %s1340_s18 = smov 0  }
   0x3   :  { %s1342_s19 = smov 0   ;;  %s1344_s20 = smov 0  }
   0x4   :  { %s1346_s21 = smov 0   ;;  %s1348_s22 = smov 0  }
   0x5 LB: > { %s874_s23 = sadd.s32 4294967295, %s1302_s22   ;;  %s26_s24 = sadd.s32 1, %s1294_s20  ;;  %s1302_s22 = sphi %s1348_s22, %s17_s22   ;;  %s1298_s21 = sphi %s1346_s21, %s1550_s21   ;;  %s1294_s20 = sphi %s1344_s20, %s1549_s20   ;;  %s1290_s19 = sphi %s1342_s19, %s1548_s19   ;;  %s1286_s18 = sphi %s1340_s18, %s1547_s18   ;;  %s1282_s17 = sphi %s1338_s17, %s1546_s17   ;;  %s1278_s16 = sphi %s1336_s16, %s1545_s16   ;;  %s1274_s15 = sphi %s1334_s15, %s1544_s15  }
   0x6   : > { %p27_p0 = scmp.ge.s32.totalorder %s26_s24, 5  ;;  %s29_s25 = sadd.s32 1, %s1298_s21 }
   0x7   : > { %s38_s26 = sadd.s32 1, %s1282_s17  ;;  %p45_p1 = scmp.ne.s32.totalorder %s1282_s17, %s1278_s16 }
   0x8   : > { %s1552_s24 = smov (%p27_p0, %s26_s24), 0  ;;  %s1554_s25 = smov (!%p27_p0, %s29_s25), %s1298_s21 }
   0x9   : > { %s34_s27 = ssub.s32 %s1294_s20, %s1552_s24  ;;  %p46_p2 = scmp.eq.s32.totalorder %s1302_s22, 0 }
   0xa   : > { %p31_p3 = scmp.ge.s32.totalorder %s1554_s25, 5  ;;  %p51_p4 = scmp.ne.s32.totalorder %s1278_s16, %s1274_s15 }
   0xb   : > { %p1385_p5 = por %p46_p2, %p45_p1  ;;  %p52_p6 = scmp.eq.s32.totalorder %s874_s23, 0 }
   0xc   : > { %s1556_s25 = smov (%p31_p3, %s1554_s25), 0  ;;  %p1123_p8 = scmp.lt.s32.totalorder %s1302_s22, 25 }
   0xd   : > { %1540 = sst [smem:[#allocation6_spill]] %s1556_s25  ;;  %p1391_p7 = por %p52_p6, %p51_p4 }
   0xe   : > { %s33_s30 = ssub.s32 %s1298_s21, %s1556_s25  ;;  %s173_s6 = sand.u32 1, %s1282_s17  }
   0xf   : > { %s35_s5 = sor.u32 %s34_s27, %s33_s30  ;;  %s878_s7 = sshll.u32 %s173_s6, 5 }
  0x10   : > { %p36_p9 = scmp.eq.s32.totalorder %s35_s5, 0  ;;  %s1116_s8 = smul.u32 20, %s1298_s21 }
  0x11   : > { %s177_s12 = scalar_lea.vmem [#allocation3], %s878_s7  ;;  %p1411_p10 = pnand %p1123_p8, %p1385_p5 }
  0x12   : > { %s1401_s9 = scalar_select %p36_p9, %s1282_s17, %s38_s26  }
  0x13   : > { %s183_s10 = sadd.s32 %s1294_s20, %s1116_s8  ;;  %s186_s13 = sshll.u32 %s177_s12, 4  ;;  %s187_s13 = int_to_ptr.vmem [resolvable:$true] %s186_s13 }
  0x14   : > { %s881_s11 = sshll.u32 %s183_s10, 7  ;;  %p882_p11 = scmp.ge.s32.totalorder %s1302_s22, 1 }
  0x15   : > { %s185_s23 = scalar_lea.hbm %s1533_s0, %s881_s11  ;;  %s174_s27 = scalar_lea.sflag [#allocation4], %s173_s6 }
  0x16   : > { %p1210_p12 = pneg %p1411_p10  ;;  %s1221_s26 = scalar_lea.vmem %s187_s13, 512 }
  0x17   : > { %p1222_p13 = scmp.ne.s32.totalorder %s187_s13, %s1221_s26  ;;  %s1304_s30 = smov [#allocation3]  }
  0x18   : > { %s1226_s5 = sshll.u32 %s1304_s30, 4  ;;  %s1227_s5 = int_to_ptr.vmem [resolvable:$false] %s1226_s5 }
  0x19   : > { %p1224_p0 = pnand %p1222_p13, %p1210_p12  ;;  %s1228_s7 = scalar_lea.vmem %s1227_s5, 1024 }
  0x1a   : > { %p1229_p2 = scmp.lt.s32.totalorder %s187_s13, %s1227_s5  ;;  %p1230_p3 = scmp.lt.s32.totalorder %s1228_s7, %s1221_s26 }
  0x1b   : > { %p1225_p1 = pneg %p1224_p0 }
  0x1c   : > { %p1231_p4 = por %p1230_p3, %p1229_p2 }
  0x1e   : > { %p1232_p5 = pnand %p1231_p4, %p1225_p1 }
  0x20   : > { %1235 = shalt.err (!%p1232_p5)
}
  0x21   : > { %s1305_s28 = smov 640   ;;  %s1306_s6 = smov 128  }
  0x22   : > { %s1307_s8 = smov 8   ;;  %p194_p6 = scmp.lt.s32.totalorder %s1302_s22, 26 }
  0x23   : > { %1122 = dma.hbm_to_vmem [thread:$0]  (!%p1411_p10), %s185_s23, 512, %s187_s13, %s174_s27, %s1305_s28, %s1306_s6, %s1307_s8  }
  0x24   : > { %p195_p8 = pnand %p882_p11, %p194_p6 }
  0x25   : > { %s200_s10 = sand.u32 (!%p195_p8), 1, %s1278_s16  }
  0x26   : > { %198 = sbr.rel (%p195_p8) target bundleno = 550 (0x226), region = 36  ;;  %s883_s11 = sshll.u32 (!%p195_p8), %s200_s10, 5 }
  0x27   : > { %s201_s12 = scalar_lea.sflag (!%p195_p8), [#allocation4], %s200_s10  ;;  %s1424_s14 = scalar_lea.vmem (!%p195_p8), [#allocation3], %s883_s11 }
  0x2b   : > { %1269 = dma.done.wait (%p1391_p7), %s201_s12, 512  }
  0x2c   : > { %1271 = vsyncadd (%p1391_p7), %s201_s12, 4294966784  ;;  %s884_s15 = sshll.u32 %s1290_s19, 4  ;;  %p886_p10 = scmp.ne.s32.totalorder %s1286_s18, 0 }
  0x2d   : > { %p231_p9 = scmp.lt.s32.totalorder %s884_s15, 79 }
  0x2e   : > { %240 = sbr.rel (%p886_p10) target bundleno = 60 (0x3c), region = 44 }
  0x2f   : > { %s1558_s15 = smov (!%p231_p9, %s884_s15), 79 }
  0x30   : > { %s885_s25 = sshll.u32 %s1558_s15, 2 }
  0x31   : > { %s1434_s27 = scalar_lea.vmem %s1537_s4, %s885_s25 }
  0x33   : > { %v1308_v0 = vmov 0.0  }
  0x34   : > { %241 = vst [vmem:[#allocation2 + $0x30] sm:$0xff] %v1308_v0  ;;  %242 = vst [vmem:[#allocation2] sm:$0xff] %v1308_v0 }
  0x35   : > { %243 = vst [vmem:[#allocation2 + $0x58] sm:$0xff] %v1308_v0  ;;  %244 = vst [vmem:[#allocation2 + $0x18] sm:$0xff] %v1308_v0 }
  0x36   : > { %245 = vst [vmem:[#allocation2 + $0x50] sm:$0xff] %v1308_v0  ;;  %246 = vst [vmem:[#allocation2 + $0x68] sm:$0xff] %v1308_v0 }
  0x37   : > { %247 = vst [vmem:[#allocation2 + $0x8] sm:$0xff] %v1308_v0  ;;  %248 = vst [vmem:[#allocation2 + $0x48] sm:$0xff] %v1308_v0 }
  0x38   : > { %249 = vst [vmem:[#allocation2 + $0x40] sm:$0xff] %v1308_v0  ;;  %250 = vst [vmem:[#allocation2 + $0x20] sm:$0xff] %v1308_v0 }
  0x39   : > { %251 = vst [vmem:[#allocation2 + $0x10] sm:$0xff] %v1308_v0  ;;  %252 = vst [vmem:[#allocation2 + $0x38] sm:$0xff] %v1308_v0 }
  0x3a   : > { %253 = vst [vmem:[#allocation2 + $0x60] sm:$0xff] %v1308_v0  ;;  %254 = vst [vmem:[#allocation2 + $0x70] sm:$0xff] %v1308_v0 }
  0x3b   : > { %255 = vst [vmem:[#allocation2 + $0x78] sm:$0xff] %v1308_v0  ;;  %256 = vst [vmem:[#allocation2 + $0x28] sm:$0xff] %v1308_v0 }
  0x3c PF: > { %s887_s19 = sshll.u32 %s1286_s18, 7  ;;  %v257_v1 = vld [vmem:[%s1424_s14] sm:$0xff]  ;;  %v259_v2 = vld [vmem:[%s1424_s14 + $0x10] sm:$0xff]  ;;  %v258_v13 = vld [vmem:[%s1424_s14 + $0x8] sm:$0xff]  ;;  %p897_p7 = scmp.ne.s32.totalorder %s1286_s18, 4 }
  0x3d   : > { %s270_s29 = sshra.s32 %s887_s19, 3  ;;  %v261_v3 = vunpack.c.l.s8.bf16 %v257_v1  ;;  %v265_v4 = vunpack.c.l.s8.bf16 %v259_v2  ;;  %v260_v14 = vld [vmem:[%s1424_s14 + $0x18] sm:$0xff]  ;;  %v262_v15 = vunpack.c.h.s8.bf16 %v257_v1  ;;  %v266_v16 = vunpack.c.h.s8.bf16 %v259_v2  ;;  %v290_v25 = vld [vmem:[#allocation2 + $0x30] sm:$0xff]  ;;  %v291_v37 = vld [vmem:[#allocation2] sm:$0xff] }
  0x3e   : > { %s888_s26 = sshll.u32 %s270_s29, 2  ;;  %v263_v17 = vunpack.c.l.s8.bf16 %v258_v13  ;;  %v267_v18 = vunpack.c.l.s8.bf16 %v260_v14  ;;  %v264_v19 = vunpack.c.h.s8.bf16 %v258_v13  ;;  %v268_v20 = vunpack.c.h.s8.bf16 %v260_v14  ;;  %v292_v21 = vld [vmem:[#allocation2 + $0x58] sm:$0xff]  ;;  %v296_v43 = vld [vmem:[#allocation2 + $0x8] sm:$0xff]  ;;  %v294_v49 = vld [vmem:[#allocation2 + $0x50] sm:$0xff] }
  0x3f   : > { %s1443_s7 = scalar_lea.vmem %s1534_s1, %s888_s26  ;;  %1036 = vmatprep.mubr.bf16.mxu0 %v261_v3  ;;  %1044 = vmatprep.mubr.bf16.mxu1 %v265_v4  ;;  %v298_v26 = vld [vmem:[#allocation2 + $0x40] sm:$0xff]  ;;  %v293_v31 = vld [vmem:[#allocation2 + $0x18] sm:$0xff]  ;;  %v297_v55 = vld [vmem:[#allocation2 + $0x48] sm:$0xff] }
  0x40   : > { %v1192_v5 = vld [vmem:[%s1443_s7 + $0x38] sm:$0xff]   ;;  %v1193_v6 = vld [vmem:[%s1443_s7 + $0x30] sm:$0xff]   ;;  %v1194_v7 = vld [vmem:[%s1443_s7 + $0x28] sm:$0xff]  }
  0x41   : > { %1020 = vmatprep.subr.bf16.mxu0 %v1192_v5  ;;  %1084 = vmatprep.subr.bf16.mxu1 %v1192_v5  ;;  %v1195_v8 = vld [vmem:[%s1443_s7 + $0x20] sm:$0xff]   ;;  %v1196_v9 = vld [vmem:[%s1443_s7 + $0x18] sm:$0xff]   ;;  %v1197_v10 = vld [vmem:[%s1443_s7 + $0x10] sm:$0xff]  }
  0x42   : > { %1021 = vmatpush3.bf16.msra.mxu0 %v1192_v5  ;;  %1092 = vmatpush3.bf16.msra.mxu1 %v1192_v5  ;;  %v1198_v11 = vld [vmem:[%s1443_s7 + $0x8] sm:$0xff]   ;;  %v1199_v12 = vld [vmem:[%s1443_s7] sm:$0xff]   ;;  %v300_v22 = vld [vmem:[#allocation2 + $0x10] sm:$0xff] }
  0x43   : > { %1022 = vmatprep.subr.bf16.mxu0 %v1193_v6  ;;  %1085 = vmatprep.subr.bf16.mxu1 %v1193_v6  ;;  %v301_v32 = vld [vmem:[#allocation2 + $0x38] sm:$0xff]  ;;  %v299_v38 = vld [vmem:[#allocation2 + $0x20] sm:$0xff]  ;;  %v305_v56 = vld [vmem:[#allocation2 + $0x28] sm:$0xff] }
  0x44   : > { %v304_v44 = vld [vmem:[#allocation2 + $0x78] sm:$0xff]  ;;  %v302_v50 = vld [vmem:[#allocation2 + $0x60] sm:$0xff]  ;;  %v295_v61 = vld [vmem:[#allocation2 + $0x68] sm:$0xff] }
  0x45   : > { %v303_v62 = vld [vmem:[#allocation2 + $0x70] sm:$0xff] }
  0x46   : > { %1023 = vmatpush3.bf16.msra.mxu0 %v1193_v6  ;;  %1093 = vmatpush3.bf16.msra.mxu1 %v1193_v6 }
  0x47   : > { %1024 = vmatprep.subr.bf16.mxu0 %v1194_v7  ;;  %1086 = vmatprep.subr.bf16.mxu1 %v1194_v7 }
  0x4a   : > { %1025 = vmatpush3.bf16.msra.mxu0 %v1194_v7  ;;  %1094 = vmatpush3.bf16.msra.mxu1 %v1194_v7 }
  0x4b   : > { %1026 = vmatprep.subr.bf16.mxu0 %v1195_v8  ;;  %1087 = vmatprep.subr.bf16.mxu1 %v1195_v8 }
  0x4e   : > { %1027 = vmatpush3.bf16.msra.mxu0 %v1195_v8  ;;  %1095 = vmatpush3.bf16.msra.mxu1 %v1195_v8 }
  0x4f   : > { %1028 = vmatprep.subr.bf16.mxu0 %v1196_v9  ;;  %1088 = vmatprep.subr.bf16.mxu1 %v1196_v9 }
  0x52   : > { %1029 = vmatpush3.bf16.msra.mxu0 %v1196_v9  ;;  %1096 = vmatpush3.bf16.msra.mxu1 %v1196_v9 }
  0x53   : > { %1030 = vmatprep.subr.bf16.mxu0 %v1197_v10  ;;  %1089 = vmatprep.subr.bf16.mxu1 %v1197_v10 }
  0x56   : > { %1031 = vmatpush3.bf16.msra.mxu0 %v1197_v10  ;;  %1097 = vmatpush3.bf16.msra.mxu1 %v1197_v10 }
  0x57   : > { %1032 = vmatprep.subr.bf16.mxu0 %v1198_v11  ;;  %1090 = vmatprep.subr.bf16.mxu1 %v1198_v11 }
  0x5a   : > { %1033 = vmatpush3.bf16.msra.mxu0 %v1198_v11  ;;  %1098 = vmatpush3.bf16.msra.mxu1 %v1198_v11 }
  0x5b   : > { %1034 = vmatprep.subr.bf16.mxu0 %v1199_v12  ;;  %1091 = vmatprep.subr.bf16.mxu1 %v1199_v12 }
  0x5e   : > { %1035 = vmatpush3.bf16.msra.mxu0 %v1199_v12  ;;  %1099 = vmatpush3.bf16.msra.mxu1 %v1199_v12 }
  0x61   : > { %1037 = vmatmul.mubr.bf16.vlgmr.msra.gmra.mxu0 %v262_v15  ;;  %1045 = vmatmul.mubr.bf16.vlgmr.msra.gmra.mxu1 %v266_v16 }
  0x62   : > { %1040 = vmatprep.mubr.bf16.mxu0 %v263_v17  ;;  %1048 = vmatprep.mubr.bf16.mxu1 %v267_v18 }
  0x69   : > { %1041 = vmatmul.mubr.bf16.gmra.mxu0 %v264_v19  ;;  %1049 = vmatmul.mubr.bf16.gmra.mxu1 %v268_v20 }
 0x121   : > { %v1038_v23 = vpop.f32.mrf.mxu0  ;;  %v1046_v24 = vpop.f32.mrf.mxu1 }
 0x122   : > { %v453_v27 = vadd.f32 %v1038_v23, %v292_v21  ;;  %v461_v28 = vadd.f32 %v1046_v24, %v300_v22 }
 0x123   : > { %v388_v29 = vpop.f32.mrf.mxu0  ;;  %v420_v30 = vpop.f32.mrf.mxu1 }
 0x124   : > { %469 = vst [vmem:[#allocation2 + $0x58] sm:$0xff] %v453_v27  ;;  %477 = vst [vmem:[#allocation2 + $0x10] sm:$0xff] %v461_v28  ;;  %v451_v33 = vadd.f32 %v388_v29, %v290_v25  ;;  %v459_v34 = vadd.f32 %v420_v30, %v298_v26 }
 0x125   : > { %v1039_v35 = vpop.f32.mrf.mxu0  ;;  %v1047_v36 = vpop.f32.mrf.mxu1 }
 0x126   : > { %467 = vst [vmem:[#allocation2 + $0x30] sm:$0xff] %v451_v33  ;;  %475 = vst [vmem:[#allocation2 + $0x40] sm:$0xff] %v459_v34  ;;  %v454_v39 = vadd.f32 %v1039_v35, %v293_v31  ;;  %v462_v40 = vadd.f32 %v1047_v36, %v301_v32 }
 0x127   : > { %v391_v41 = vpop.f32.mrf.mxu0  ;;  %v423_v42 = vpop.f32.mrf.mxu1 }
 0x128   : > { %470 = vst [vmem:[#allocation2 + $0x18] sm:$0xff] %v454_v39  ;;  %478 = vst [vmem:[#allocation2 + $0x38] sm:$0xff] %v462_v40  ;;  %v452_v45 = vadd.f32 %v391_v41, %v291_v37  ;;  %v460_v46 = vadd.f32 %v423_v42, %v299_v38 }
 0x129   : > { %v1042_v47 = vpop.f32.mrf.mxu0  ;;  %v1050_v48 = vpop.f32.mrf.mxu1 }
 0x12a   : > { %468 = vst [vmem:[#allocation2] sm:$0xff] %v452_v45  ;;  %476 = vst [vmem:[#allocation2 + $0x20] sm:$0xff] %v460_v46  ;;  %v457_v51 = vadd.f32 %v1042_v47, %v296_v43  ;;  %v465_v52 = vadd.f32 %v1050_v48, %v304_v44 }
 0x12b   : > { %v404_v53 = vpop.f32.mrf.mxu0  ;;  %v436_v54 = vpop.f32.mrf.mxu1 }
 0x12c   : > { %473 = vst [vmem:[#allocation2 + $0x8] sm:$0xff] %v457_v51  ;;  %481 = vst [vmem:[#allocation2 + $0x78] sm:$0xff] %v465_v52  ;;  %v455_v57 = vadd.f32 %v404_v53, %v294_v49  ;;  %v463_v58 = vadd.f32 %v436_v54, %v302_v50 }
 0x12d   : > { %v1043_v59 = vpop.f32.mrf.mxu0  ;;  %v1051_v60 = vpop.f32.mrf.mxu1 }
 0x12e   : > { %471 = vst [vmem:[#allocation2 + $0x50] sm:$0xff] %v455_v57  ;;  %479 = vst [vmem:[#allocation2 + $0x60] sm:$0xff] %v463_v58  ;;  %v458_v63 = vadd.f32 %v1043_v59, %v297_v55  ;;  %v466_v0 = vadd.f32 %v1051_v60, %v305_v56  ;;  %486 = sbr.rel (%p897_p7) target bundleno = 550 (0x226), region = 48 }
 0x12f   : > { %v407_v1 = vpop.f32.mrf.mxu0  ;;  %v439_v2 = vpop.f32.mrf.mxu1 }
 0x130   : > { %474 = vst [vmem:[#allocation2 + $0x48] sm:$0xff] %v458_v63  ;;  %482 = vst [vmem:[#allocation2 + $0x28] sm:$0xff] %v466_v0  ;;  %v456_v3 = vadd.f32 %v407_v1, %v295_v61  ;;  %v464_v4 = vadd.f32 %v439_v2, %v303_v62 }
 0x132   : > { %472 = vst [vmem:[#allocation2 + $0x68] sm:$0xff] %v456_v3  ;;  %480 = vst [vmem:[#allocation2 + $0x70] sm:$0xff] %v464_v4 }
 0x133   : > { %v1200_v5 = vld [vmem:[%s1536_s3 + $0x38] sm:$0xff]   ;;  %v1201_v6 = vld [vmem:[%s1536_s3 + $0x30] sm:$0xff]   ;;  %v1202_v7 = vld [vmem:[%s1536_s3 + $0x28] sm:$0xff]  }
 0x134   : > { %1052 = vmatprep.subr.bf16.mxu0 %v1200_v5  ;;  %1100 = vmatprep.subr.bf16.mxu1 %v1200_v5  ;;  %v1203_v8 = vld [vmem:[%s1536_s3 + $0x20] sm:$0xff]   ;;  %v487_v9 = vld [vmem:[#allocation2 + $0x30] sm:$0xff]  ;;  %v1204_v20 = vld [vmem:[%s1536_s3 + $0x18] sm:$0xff]  }
 0x135   : > { %1053 = vmatpush3.bf16.msra.mxu0 %v1200_v5  ;;  %1108 = vmatpush3.bf16.msra.mxu1 %v1200_v5  ;;  %v488_v10 = vld [vmem:[#allocation2] sm:$0xff]  ;;  %v1205_v25 = vld [vmem:[%s1536_s3 + $0x10] sm:$0xff]   ;;  %v1206_v26 = vld [vmem:[%s1536_s3 + $0x8] sm:$0xff]  }
 0x136   : > { %1054 = vmatprep.subr.bf16.mxu0 %v1201_v6  ;;  %1101 = vmatprep.subr.bf16.mxu1 %v1201_v6  ;;  %v1471_v11 = vld [vmem:[%s1535_s2] ss:$0 sm:$0xff]  ;;  %v489_v27 = vld [vmem:[#allocation2 + $0x58] sm:$0xff]  ;;  %v497_v29 = vld [vmem:[#allocation2 + $0x10] sm:$0xff] }
 0x137   : > { %v510_v12 = vadd.f32 %v1471_v11, %v487_v9  ;;  %v511_v13 = vadd.f32 %v1471_v11, %v488_v10  ;;  %v495_v14 = vld [vmem:[#allocation2 + $0x40] sm:$0xff]  ;;  %v490_v28 = vld [vmem:[#allocation2 + $0x18] sm:$0xff]  ;;  %v491_v31 = vld [vmem:[#allocation2 + $0x50] sm:$0xff]  ;;  %v512_v35 = vadd.f32 %v1471_v11, %v489_v27  ;;  %v520_v37 = vadd.f32 %v1471_v11, %v497_v29 }
 0x138   : > { %v496_v15 = vld [vmem:[#allocation2 + $0x20] sm:$0xff]  ;;  %v518_v16 = vadd.f32 %v1471_v11, %v495_v14  ;;  %v498_v30 = vld [vmem:[#allocation2 + $0x38] sm:$0xff]  ;;  %v513_v36 = vadd.f32 %v1471_v11, %v490_v28  ;;  %v514_v39 = vadd.f32 %v1471_v11, %v491_v31  ;;  %v493_v48 = vld [vmem:[#allocation2 + $0x8] sm:$0xff] }
 0x139   : > { %1055 = vmatpush3.bf16.msra.mxu0 %v1201_v6  ;;  %1109 = vmatpush3.bf16.msra.mxu1 %v1201_v6  ;;  %v519_v17 = vadd.f32 %v1471_v11, %v496_v15  ;;  %v526_v18 = vmax.f32 %v510_v12, 0.0  ;;  %v527_v19 = vmax.f32 %v511_v13, 0.0  ;;  %v492_v32 = vld [vmem:[#allocation2 + $0x68] sm:$0xff]  ;;  %v499_v33 = vld [vmem:[#allocation2 + $0x60] sm:$0xff]  ;;  %v500_v34 = vld [vmem:[#allocation2 + $0x70] sm:$0xff]  ;;  %v521_v38 = vadd.f32 %v1471_v11, %v498_v30 }
 0x13a   : > { %1056 = vmatprep.subr.bf16.mxu0 %v1202_v7  ;;  %1102 = vmatprep.subr.bf16.mxu1 %v1202_v7  ;;  %v534_v21 = vmax.f32 %v518_v16, 0.0  ;;  %v515_v40 = vadd.f32 %v1471_v11, %v492_v32  ;;  %v522_v41 = vadd.f32 %v1471_v11, %v499_v33  ;;  %v523_v42 = vadd.f32 %v1471_v11, %v500_v34  ;;  %v1207_v43 = vld [vmem:[%s1536_s3] sm:$0xff]   ;;  %v494_v49 = vld [vmem:[#allocation2 + $0x48] sm:$0xff]  ;;  %v501_v54 = vld [vmem:[#allocation2 + $0x78] sm:$0xff] }
 0x13b   : > { %v535_v22 = vmax.f32 %v519_v17, 0.0  ;;  %v542_v23 = vpack.c.bf16 %v527_v19, %v526_v18  ;;  %v528_v44 = vmax.f32 %v512_v35, 0.0  ;;  %v529_v45 = vmax.f32 %v513_v36, 0.0  ;;  %v502_v55 = vld [vmem:[#allocation2 + $0x28] sm:$0xff] }
 0x13c   : > { %v536_v46 = vmax.f32 %v520_v37, 0.0  ;;  %v537_v47 = vmax.f32 %v521_v38, 0.0  ;;  %v530_v50 = vmax.f32 %v514_v39, 0.0  ;;  %v531_v51 = vmax.f32 %v515_v40, 0.0 }
 0x13d   : > { %1057 = vmatpush3.bf16.msra.mxu0 %v1202_v7  ;;  %1110 = vmatpush3.bf16.msra.mxu1 %v1202_v7  ;;  %v546_v24 = vpack.c.bf16 %v535_v22, %v534_v21  ;;  %v538_v52 = vmax.f32 %v522_v41, 0.0  ;;  %v539_v53 = vmax.f32 %v523_v42, 0.0  ;;  %v543_v56 = vpack.c.bf16 %v529_v45, %v528_v44 }
 0x13e   : > { %1058 = vmatprep.subr.bf16.mxu0 %v1203_v8  ;;  %1103 = vmatprep.subr.bf16.mxu1 %v1203_v8  ;;  %v516_v57 = vadd.f32 %v1471_v11, %v493_v48  ;;  %v547_v58 = vpack.c.bf16 %v537_v47, %v536_v46  ;;  %v517_v59 = vadd.f32 %v1471_v11, %v494_v49 }
 0x13f   : > { %1068 = vmatprep.mubr.bf16.mxu0 %v542_v23  ;;  %1076 = vmatprep.mubr.bf16.mxu1 %v546_v24  ;;  %v524_v60 = vadd.f32 %v1471_v11, %v501_v54  ;;  %v525_v61 = vadd.f32 %v1471_v11, %v502_v55  ;;  %v544_v62 = vpack.c.bf16 %v531_v51, %v530_v50 }
 0x140   : > { %v548_v63 = vpack.c.bf16 %v539_v53, %v538_v52  ;;  %v532_v0 = vmax.f32 %v516_v57, 0.0  ;;  %v533_v1 = vmax.f32 %v517_v59, 0.0 }
 0x141   : > { %1059 = vmatpush3.bf16.msra.mxu0 %v1203_v8  ;;  %1111 = vmatpush3.bf16.msra.mxu1 %v1203_v8  ;;  %v540_v2 = vmax.f32 %v524_v60, 0.0  ;;  %v541_v3 = vmax.f32 %v525_v61, 0.0 }
 0x142   : > { %1060 = vmatprep.subr.bf16.mxu0 %v1204_v20  ;;  %1104 = vmatprep.subr.bf16.mxu1 %v1204_v20  ;;  %v545_v4 = vpack.c.bf16 %v533_v1, %v532_v0 }
 0x143   : > { %v549_v5 = vpack.c.bf16 %v541_v3, %v540_v2 }
 0x145   : > { %1061 = vmatpush3.bf16.msra.mxu0 %v1204_v20  ;;  %1112 = vmatpush3.bf16.msra.mxu1 %v1204_v20 }
 0x146   : > { %1062 = vmatprep.subr.bf16.mxu0 %v1205_v25  ;;  %1105 = vmatprep.subr.bf16.mxu1 %v1205_v25 }
 0x149   : > { %1063 = vmatpush3.bf16.msra.mxu0 %v1205_v25  ;;  %1113 = vmatpush3.bf16.msra.mxu1 %v1205_v25 }
 0x14a   : > { %1064 = vmatprep.subr.bf16.mxu0 %v1206_v26  ;;  %1106 = vmatprep.subr.bf16.mxu1 %v1206_v26 }
 0x14d   : > { %1065 = vmatpush3.bf16.msra.mxu0 %v1206_v26  ;;  %1114 = vmatpush3.bf16.msra.mxu1 %v1206_v26 }
 0x14e   : > { %1066 = vmatprep.subr.bf16.mxu0 %v1207_v43  ;;  %1107 = vmatprep.subr.bf16.mxu1 %v1207_v43 }
 0x151   : > { %1067 = vmatpush3.bf16.msra.mxu0 %v1207_v43  ;;  %1115 = vmatpush3.bf16.msra.mxu1 %v1207_v43 }
 0x154   : > { %1069 = vmatmul.mubr.bf16.vlgmr.msra.gmra.mxu0 %v543_v56  ;;  %1077 = vmatmul.mubr.bf16.vlgmr.msra.gmra.mxu1 %v547_v58 }
 0x155   : > { %1072 = vmatprep.mubr.bf16.mxu0 %v544_v62  ;;  %1080 = vmatprep.mubr.bf16.mxu1 %v548_v63 }
 0x15c   : > { %1073 = vmatmul.mubr.bf16.gmra.mxu0 %v545_v4  ;;  %1081 = vmatmul.mubr.bf16.gmra.mxu1 %v549_v5 }
 0x214   : > { %v1070_v6 = vpop.f32.mrf.mxu0  ;;  %v1078_v7 = vpop.f32.mrf.mxu1 }
 0x216   : > { %v648_v8 = vpop.f32.mrf.mxu0  ;;  %v680_v9 = vpop.f32.mrf.mxu1 }
 0x218   : > { %v1071_v10 = vpop.f32.mrf.mxu0  ;;  %v1079_v11 = vpop.f32.mrf.mxu1 }
 0x219   : > { %v949_v12 = vpack.c.bf16 %v1071_v10, %v1070_v6  ;;  %v969_v13 = vpack.c.bf16 %v1079_v11, %v1078_v7 }
 0x21a   : > { %v651_v14 = vpop.f32.mrf.mxu0  ;;  %v683_v15 = vpop.f32.mrf.mxu1 }
 0x21b   : > { %981 = vst [vmem:[%s1434_s27 + $0x8] sm:$0xff] %v949_v12   ;;  %985 = vst [vmem:[%s1434_s27 + $0x28] sm:$0xff] %v969_v13   ;;  %v944_v16 = vpack.c.bf16 %v651_v14, %v648_v8  ;;  %v964_v17 = vpack.c.bf16 %v683_v15, %v680_v9 }
 0x21c   : > { %v1074_v18 = vpop.f32.mrf.mxu0  ;;  %v1082_v19 = vpop.f32.mrf.mxu1 }
 0x21d   : > { %945 = vst [vmem:[%s1434_s27] sm:$0xff] %v944_v16   ;;  %984 = vst [vmem:[%s1434_s27 + $0x20] sm:$0xff] %v964_v17  }
 0x21e   : > { %v664_v20 = vpop.f32.mrf.mxu0  ;;  %v696_v21 = vpop.f32.mrf.mxu1 }
 0x220   : > { %v1075_v22 = vpop.f32.mrf.mxu0  ;;  %v1083_v23 = vpop.f32.mrf.mxu1 }
 0x221   : > { %v959_v24 = vpack.c.bf16 %v1075_v22, %v1074_v18  ;;  %v979_v25 = vpack.c.bf16 %v1083_v23, %v1082_v19 }
 0x222   : > { %v667_v26 = vpop.f32.mrf.mxu0  ;;  %v699_v27 = vpop.f32.mrf.mxu1 }
 0x223   : > { %983 = vst [vmem:[%s1434_s27 + $0x18] sm:$0xff] %v959_v24   ;;  %987 = vst [vmem:[%s1434_s27 + $0x38] sm:$0xff] %v979_v25   ;;  %v954_v28 = vpack.c.bf16 %v667_v26, %v664_v20  ;;  %v974_v29 = vpack.c.bf16 %v699_v27, %v696_v21 }
 0x225   : > { %982 = vst [vmem:[%s1434_s27 + $0x10] sm:$0xff] %v954_v28   ;;  %986 = vst [vmem:[%s1434_s27 + $0x30] sm:$0xff] %v974_v29  }
 0x226 PF: > { %s17_s22 = sadd.s32 1, %s1302_s22   ;;  %s1543_s28 = sld [smem:[#allocation6_spill]] }
 0x227   : > { %p14_p11 = scmp.ge.s32.totalorder %s17_s22, 27   ;;  %s1544_s15 = smov %s1278_s16 }
 0x228   : > { %s1545_s16 = smov %s1282_s17  ;;  %s1546_s17 = smov %s1401_s9 }
 0x229   : > { %s1547_s18 = smov %s1294_s20  ;;  %s1548_s19 = smov %s1298_s21 }
 0x22a   : > { %s1549_s20 = smov %s1552_s24  ;;  %16 = sbr.rel (!%p14_p11) target bundleno = 5 (0x5), region = 85 }
 0x22c   : > { %s1550_s21 = smov %s1543_s28 }
 0x22f   :  { %813 = vsyncpa [#allocation4], 1 }
 0x230   :  { %815 = vsyncpa [#allocation4 + $0x1], 1 }

// kernel: gcn_forward.3
= control target key start
LH: loop header
LB: loop body
LE: loop exit
PB: predicated region body
PF: predicated region fallthrough
CT: control target
= control target key end

     0   :  { %s1435_s18 = smov 0   ;;  %s1437_s19 = smov 0   ;;  %s1718_s0 = inlined_call_operand.vmem [shape: s8[640,640], index: 0, kind: input, shape index: {}]   ;;  %s1719_s1 = inlined_call_operand.vmem [shape: bf16[640,128], index: 1, kind: input, shape index: {}]   ;;  %s1720_s2 = inlined_call_operand.vmem [shape: f32[1,128], index: 2, kind: input, shape index: {}]   ;;  %s1721_s3 = inlined_call_operand.vmem [shape: bf16[128,128], index: 3, kind: input, shape index: {}]   ;;  %s1722_s4 = inlined_call_operand.vmem [shape: f32[1,128], index: 4, kind: input, shape index: {}]   ;;  %s1723_s5 = inlined_call_operand.vmem [shape: f32[640,128], index: 5, kind: output, shape index: {}]  }
   0x1   :  { %s1439_s20 = smov 0   ;;  %s1441_s21 = smov 0  }
   0x2   :  { %s1443_s22 = smov 0   ;;  %s1445_s23 = smov 0  }
   0x3   :  { %s1447_s24 = smov 0  }
   0x4 LB: > { %s24_s25 = sadd.s32 1, %s1394_s22  ;;  %s27_s26 = sadd.s32 1, %s1398_s23  ;;  %s1402_s24 = sphi %s1447_s24, %s15_s24   ;;  %s1398_s23 = sphi %s1445_s23, %s1729_s23   ;;  %s1394_s22 = sphi %s1443_s22, %s1728_s22   ;;  %s1390_s21 = sphi %s1441_s21, %s1727_s21   ;;  %s1386_s20 = sphi %s1439_s20, %s1726_s20   ;;  %s1382_s19 = sphi %s1437_s19, %s1725_s19   ;;  %s1378_s18 = sphi %s1435_s18, %s1724_s18  }
   0x5   : > { %p25_p0 = scmp.ge.s32.totalorder %s24_s25, 5  ;;  %p43_p1 = scmp.ne.s32.totalorder %s1382_s19, %s1378_s18 }
   0x6   : > { %p44_p2 = scmp.eq.s32.totalorder %s1402_s24, 0  ;;  %s36_s30 = sadd.s32 1, %s1382_s19 }
   0x7   : > { %s1731_s25 = smov (%p25_p0, %s24_s25), 0  ;;  %s1733_s26 = smov (!%p25_p0, %s27_s26), %s1398_s23 }
   0x8   : > { %p45_p3 = por %p44_p2, %p43_p1  ;;  %p29_p4 = scmp.ge.s32.totalorder %s1733_s26, 5 }
   0x9   : > { %s32_s27 = ssub.s32 %s1394_s22, %s1731_s25  ;;  %p1049_p6 = scmp.ge.s32.totalorder %s1402_s24, 25 }
   0xa   : > { %s1735_s26 = smov (%p29_p4, %s1733_s26), 0 }
   0xb   : > { %s31_s28 = ssub.s32 %s1398_s23, %s1735_s26  ;;  %191 = sbr.rel (%p1049_p6) target bundleno = 25 (0x19), region = 32 }
   0xc   : > { %s33_s29 = sor.u32 %s32_s27, %s31_s28 }
   0xd   : > { %p34_p5 = scmp.eq.s32.totalorder %s33_s29, 0 }
   0xf   : > { %s1486_s6 = scalar_select %p34_p5, %s1382_s19, %s36_s30  }
  0x10   : > { %194 = sbr.rel (!%p45_p3) target bundleno = 25 (0x19), region = 36  ;;  %s196_s7 = sand.u32 (%p45_p3), 1, %s1382_s19  }
  0x11   : > { %s1210_s8 = smul.u32 (%p45_p3), 20, %s1398_s23  ;;  %s1050_s9 = sshll.u32 (%p45_p3), %s196_s7, 5 }
  0x12   : > { %s198_s15 = scalar_lea.vmem (%p45_p3), [#allocation3], %s1050_s9 }
  0x13   : > { %s201_s10 = sadd.s32 (%p45_p3), %s1394_s22, %s1210_s8 }
  0x14   : > { %s1053_s11 = sshll.u32 (%p45_p3), %s201_s10, 3 }
  0x15   : > { %s203_s14 = scalar_lea.vmem %s1718_s0, %s1053_s11 }
  0x16   : > { %v238_v0 = vld [vmem:[%s203_s14] sm:$0xff]  ;;  %v240_v1 = vld [vmem:[%s203_s14 + $0x28] sm:$0xff]  ;;  %v242_v2 = vld [vmem:[%s203_s14 + $0x50] sm:$0xff] }
  0x17   : > { %239 = vst [vmem:[%s198_s15] sm:$0xff] %v238_v0  ;;  %241 = vst [vmem:[%s198_s15 + $0x8] sm:$0xff] %v240_v1  ;;  %v244_v3 = vld [vmem:[%s203_s14 + $0x78] sm:$0xff] }
  0x18   : > { %243 = vst [vmem:[%s198_s15 + $0x10] sm:$0xff] %v242_v2  ;;  %245 = vst [vmem:[%s198_s15 + $0x18] sm:$0xff] %v244_v3 }
  0x19 PF: > { %p1054_p7 = scmp.ge.s32.totalorder %s1402_s24, 1  ;;  %p250_p8 = scmp.lt.s32.totalorder %s1402_s24, 26 }
  0x1b   : > { %p251_p9 = pnand %p1054_p7, %p250_p8 }
  0x1c   : > { %s257_s16 = sand.u32 (!%p251_p9), 1, %s1378_s18   ;;  %s1056_s17 = sshll.u32 (!%p251_p9), %s1390_s21, 4 }
  0x1d   : > { %254 = sbr.rel (%p251_p9) target bundleno = 869 (0x365), region = 74  ;;  %s1055_s27 = sshll.u32 (!%p251_p9), %s257_s16, 5 }
  0x1e   : > { %p286_p10 = scmp.lt.s32.totalorder (!%p251_p9), %s1056_s17, 79  ;;  %s1504_s8 = scalar_lea.vmem (!%p251_p9), [#allocation3], %s1055_s27 }
  0x1f   : > { %p1058_p11 = scmp.ne.s32.totalorder (!%p251_p9), %s1386_s20, 0 }
  0x22   : > { %s1737_s17 = smov (!%p286_p10, %s1056_s17), 79  ;;  %295 = sbr.rel (%p1058_p11) target bundleno = 48 (0x30), region = 82 }
  0x23   : > { %s1057_s28 = sshll.u32 %s1737_s17, 3 }
  0x24   : > { %s1502_s7 = scalar_lea.vmem %s1723_s5, %s1057_s28 }
  0x27   : > { %v1404_v4 = vmov 0.0  }
  0x28   : > { %296 = vst [vmem:[#allocation2 + $0x30] sm:$0xff] %v1404_v4  ;;  %297 = vst [vmem:[#allocation2] sm:$0xff] %v1404_v4 }
  0x29   : > { %298 = vst [vmem:[#allocation2 + $0x58] sm:$0xff] %v1404_v4  ;;  %299 = vst [vmem:[#allocation2 + $0x18] sm:$0xff] %v1404_v4 }
  0x2a   : > { %300 = vst [vmem:[#allocation2 + $0x50] sm:$0xff] %v1404_v4  ;;  %301 = vst [vmem:[#allocation2 + $0x68] sm:$0xff] %v1404_v4 }
  0x2b   : > { %302 = vst [vmem:[#allocation2 + $0x8] sm:$0xff] %v1404_v4  ;;  %303 = vst [vmem:[#allocation2 + $0x48] sm:$0xff] %v1404_v4 }
  0x2c   : > { %304 = vst [vmem:[#allocation2 + $0x40] sm:$0xff] %v1404_v4  ;;  %305 = vst [vmem:[#allocation2 + $0x20] sm:$0xff] %v1404_v4 }
  0x2d   : > { %306 = vst [vmem:[#allocation2 + $0x10] sm:$0xff] %v1404_v4  ;;  %307 = vst [vmem:[#allocation2 + $0x38] sm:$0xff] %v1404_v4 }
  0x2e   : > { %308 = vst [vmem:[#allocation2 + $0x60] sm:$0xff] %v1404_v4  ;;  %309 = vst [vmem:[#allocation2 + $0x70] sm:$0xff] %v1404_v4 }
  0x2f   : > { %310 = vst [vmem:[#allocation2 + $0x78] sm:$0xff] %v1404_v4  ;;  %311 = vst [vmem:[#allocation2 + $0x28] sm:$0xff] %v1404_v4 }
  0x30 PF: > { %s1059_s18 = sshll.u32 %s1386_s20, 7  ;;  %v312_v5 = vld [vmem:[%s1504_s8] sm:$0xff]  ;;  %v314_v6 = vld [vmem:[%s1504_s8 + $0x10] sm:$0xff]  ;;  %v313_v17 = vld [vmem:[%s1504_s8 + $0x8] sm:$0xff]  ;;  %p1069_p12 = scmp.ne.s32.totalorder %s1386_s20, 4 }
  0x31   : > { %s325_s21 = sshra.s32 %s1059_s18, 3  ;;  %v316_v7 = vunpack.c.l.s8.bf16 %v312_v5  ;;  %v320_v8 = vunpack.c.l.s8.bf16 %v314_v6  ;;  %v315_v18 = vld [vmem:[%s1504_s8 + $0x18] sm:$0xff]  ;;  %v317_v19 = vunpack.c.h.s8.bf16 %v312_v5  ;;  %v321_v20 = vunpack.c.h.s8.bf16 %v314_v6  ;;  %v345_v29 = vld [vmem:[#allocation2 + $0x30] sm:$0xff]  ;;  %v346_v41 = vld [vmem:[#allocation2] sm:$0xff] }
  0x32   : > { %s1060_s9 = sshll.u32 %s325_s21, 2  ;;  %v318_v21 = vunpack.c.l.s8.bf16 %v313_v17  ;;  %v322_v22 = vunpack.c.l.s8.bf16 %v315_v18  ;;  %v319_v23 = vunpack.c.h.s8.bf16 %v313_v17  ;;  %v323_v24 = vunpack.c.h.s8.bf16 %v315_v18  ;;  %v347_v25 = vld [vmem:[#allocation2 + $0x58] sm:$0xff]  ;;  %v351_v47 = vld [vmem:[#allocation2 + $0x8] sm:$0xff]  ;;  %v349_v53 = vld [vmem:[#allocation2 + $0x50] sm:$0xff] }
  0x33   : > { %s1513_s12 = scalar_lea.vmem %s1719_s1, %s1060_s9  ;;  %1130 = vmatprep.mubr.bf16.mxu0 %v316_v7  ;;  %1138 = vmatprep.mubr.bf16.mxu1 %v320_v8  ;;  %v353_v30 = vld [vmem:[#allocation2 + $0x40] sm:$0xff]  ;;  %v348_v35 = vld [vmem:[#allocation2 + $0x18] sm:$0xff]  ;;  %v352_v59 = vld [vmem:[#allocation2 + $0x48] sm:$0xff] }
  0x34   : > { %v1268_v9 = vld [vmem:[%s1513_s12 + $0x38] sm:$0xff]   ;;  %v1269_v10 = vld [vmem:[%s1513_s12 + $0x30] sm:$0xff]   ;;  %v1270_v11 = vld [vmem:[%s1513_s12 + $0x28] sm:$0xff]  }
  0x35   : > { %1114 = vmatprep.subr.bf16.mxu0 %v1268_v9  ;;  %1178 = vmatprep.subr.bf16.mxu1 %v1268_v9  ;;  %v1271_v12 = vld [vmem:[%s1513_s12 + $0x20] sm:$0xff]   ;;  %v1272_v13 = vld [vmem:[%s1513_s12 + $0x18] sm:$0xff]   ;;  %v1273_v14 = vld [vmem:[%s1513_s12 + $0x10] sm:$0xff]  }
  0x36   : > { %1115 = vmatpush3.bf16.msra.mxu0 %v1268_v9  ;;  %1186 = vmatpush3.bf16.msra.mxu1 %v1268_v9  ;;  %v1274_v15 = vld [vmem:[%s1513_s12 + $0x8] sm:$0xff]   ;;  %v1275_v16 = vld [vmem:[%s1513_s12] sm:$0xff]   ;;  %v355_v26 = vld [vmem:[#allocation2 + $0x10] sm:$0xff] }
  0x37   : > { %1116 = vmatprep.subr.bf16.mxu0 %v1269_v10  ;;  %1179 = vmatprep.subr.bf16.mxu1 %v1269_v10  ;;  %v356_v36 = vld [vmem:[#allocation2 + $0x38] sm:$0xff]  ;;  %v354_v42 = vld [vmem:[#allocation2 + $0x20] sm:$0xff]  ;;  %v360_v60 = vld [vmem:[#allocation2 + $0x28] sm:$0xff] }
  0x38   : > { %v359_v48 = vld [vmem:[#allocation2 + $0x78] sm:$0xff]  ;;  %v357_v54 = vld [vmem:[#allocation2 + $0x60] sm:$0xff]  ;;  %v350_v1 = vld [vmem:[#allocation2 + $0x68] sm:$0xff] }
  0x39   : > { %v358_v2 = vld [vmem:[#allocation2 + $0x70] sm:$0xff] }
  0x3a   : > { %1117 = vmatpush3.bf16.msra.mxu0 %v1269_v10  ;;  %1187 = vmatpush3.bf16.msra.mxu1 %v1269_v10 }
  0x3b   : > { %1118 = vmatprep.subr.bf16.mxu0 %v1270_v11  ;;  %1180 = vmatprep.subr.bf16.mxu1 %v1270_v11 }
  0x3e   : > { %1119 = vmatpush3.bf16.msra.mxu0 %v1270_v11  ;;  %1188 = vmatpush3.bf16.msra.mxu1 %v1270_v11 }
  0x3f   : > { %1120 = vmatprep.subr.bf16.mxu0 %v1271_v12  ;;  %1181 = vmatprep.subr.bf16.mxu1 %v1271_v12 }
  0x42   : > { %1121 = vmatpush3.bf16.msra.mxu0 %v1271_v12  ;;  %1189 = vmatpush3.bf16.msra.mxu1 %v1271_v12 }
  0x43   : > { %1122 = vmatprep.subr.bf16.mxu0 %v1272_v13  ;;  %1182 = vmatprep.subr.bf16.mxu1 %v1272_v13 }
  0x46   : > { %1123 = vmatpush3.bf16.msra.mxu0 %v1272_v13  ;;  %1190 = vmatpush3.bf16.msra.mxu1 %v1272_v13 }
  0x47   : > { %1124 = vmatprep.subr.bf16.mxu0 %v1273_v14  ;;  %1183 = vmatprep.subr.bf16.mxu1 %v1273_v14 }
  0x4a   : > { %1125 = vmatpush3.bf16.msra.mxu0 %v1273_v14  ;;  %1191 = vmatpush3.bf16.msra.mxu1 %v1273_v14 }
  0x4b   : > { %1126 = vmatprep.subr.bf16.mxu0 %v1274_v15  ;;  %1184 = vmatprep.subr.bf16.mxu1 %v1274_v15 }
  0x4e   : > { %1127 = vmatpush3.bf16.msra.mxu0 %v1274_v15  ;;  %1192 = vmatpush3.bf16.msra.mxu1 %v1274_v15 }
  0x4f   : > { %1128 = vmatprep.subr.bf16.mxu0 %v1275_v16  ;;  %1185 = vmatprep.subr.bf16.mxu1 %v1275_v16 }
  0x52   : > { %1129 = vmatpush3.bf16.msra.mxu0 %v1275_v16  ;;  %1193 = vmatpush3.bf16.msra.mxu1 %v1275_v16 }
  0x55   : > { %1131 = vmatmul.mubr.bf16.vlgmr.msra.gmra.mxu0 %v317_v19  ;;  %1139 = vmatmul.mubr.bf16.vlgmr.msra.gmra.mxu1 %v321_v20 }
  0x56   : > { %1134 = vmatprep.mubr.bf16.mxu0 %v318_v21  ;;  %1142 = vmatprep.mubr.bf16.mxu1 %v322_v22 }
  0x5d   : > { %1135 = vmatmul.mubr.bf16.gmra.mxu0 %v319_v23  ;;  %1143 = vmatmul.mubr.bf16.gmra.mxu1 %v323_v24 }
 0x115   : > { %v1132_v27 = vpop.f32.mrf.mxu0  ;;  %v1140_v28 = vpop.f32.mrf.mxu1 }
 0x116   : > { %v508_v31 = vadd.f32 %v1132_v27, %v347_v25  ;;  %v516_v32 = vadd.f32 %v1140_v28, %v355_v26 }
 0x117   : > { %v443_v33 = vpop.f32.mrf.mxu0  ;;  %v475_v34 = vpop.f32.mrf.mxu1 }
 0x118   : > { %524 = vst [vmem:[#allocation2 + $0x58] sm:$0xff] %v508_v31  ;;  %532 = vst [vmem:[#allocation2 + $0x10] sm:$0xff] %v516_v32  ;;  %v506_v37 = vadd.f32 %v443_v33, %v345_v29  ;;  %v514_v38 = vadd.f32 %v475_v34, %v353_v30 }
 0x119   : > { %v1133_v39 = vpop.f32.mrf.mxu0  ;;  %v1141_v40 = vpop.f32.mrf.mxu1 }
 0x11a   : > { %522 = vst [vmem:[#allocation2 + $0x30] sm:$0xff] %v506_v37  ;;  %530 = vst [vmem:[#allocation2 + $0x40] sm:$0xff] %v514_v38  ;;  %v509_v43 = vadd.f32 %v1133_v39, %v348_v35  ;;  %v517_v44 = vadd.f32 %v1141_v40, %v356_v36 }
 0x11b   : > { %v446_v45 = vpop.f32.mrf.mxu0  ;;  %v478_v46 = vpop.f32.mrf.mxu1 }
 0x11c   : > { %525 = vst [vmem:[#allocation2 + $0x18] sm:$0xff] %v509_v43  ;;  %533 = vst [vmem:[#allocation2 + $0x38] sm:$0xff] %v517_v44  ;;  %v507_v49 = vadd.f32 %v446_v45, %v346_v41  ;;  %v515_v50 = vadd.f32 %v478_v46, %v354_v42 }
 0x11d   : > { %v1136_v51 = vpop.f32.mrf.mxu0  ;;  %v1144_v52 = vpop.f32.mrf.mxu1 }
 0x11e   : > { %523 = vst [vmem:[#allocation2] sm:$0xff] %v507_v49  ;;  %531 = vst [vmem:[#allocation2 + $0x20] sm:$0xff] %v515_v50  ;;  %v512_v55 = vadd.f32 %v1136_v51, %v351_v47  ;;  %v520_v56 = vadd.f32 %v1144_v52, %v359_v48 }
 0x11f   : > { %v459_v57 = vpop.f32.mrf.mxu0  ;;  %v491_v58 = vpop.f32.mrf.mxu1 }
 0x120   : > { %528 = vst [vmem:[#allocation2 + $0x8] sm:$0xff] %v512_v55  ;;  %536 = vst [vmem:[#allocation2 + $0x78] sm:$0xff] %v520_v56  ;;  %v510_v61 = vadd.f32 %v459_v57, %v349_v53  ;;  %v518_v62 = vadd.f32 %v491_v58, %v357_v54 }
 0x121   : > { %v1137_v63 = vpop.f32.mrf.mxu0  ;;  %v1145_v0 = vpop.f32.mrf.mxu1 }
 0x122   : > { %526 = vst [vmem:[#allocation2 + $0x50] sm:$0xff] %v510_v61  ;;  %534 = vst [vmem:[#allocation2 + $0x60] sm:$0xff] %v518_v62  ;;  %v513_v3 = vadd.f32 %v1137_v63, %v352_v59  ;;  %v521_v4 = vadd.f32 %v1145_v0, %v360_v60  ;;  %541 = sbr.rel (%p1069_p12) target bundleno = 869 (0x365), region = 86 }
 0x123   : > { %v462_v5 = vpop.f32.mrf.mxu0  ;;  %v494_v6 = vpop.f32.mrf.mxu1 }
 0x124   : > { %529 = vst [vmem:[#allocation2 + $0x48] sm:$0xff] %v513_v3  ;;  %537 = vst [vmem:[#allocation2 + $0x28] sm:$0xff] %v521_v4  ;;  %v511_v7 = vadd.f32 %v462_v5, %v350_v1  ;;  %v519_v8 = vadd.f32 %v494_v6, %v358_v2 }
 0x126   : > { %527 = vst [vmem:[#allocation2 + $0x68] sm:$0xff] %v511_v7  ;;  %535 = vst [vmem:[#allocation2 + $0x70] sm:$0xff] %v519_v8 }
 0x127   : > { %v1276_v9 = vld [vmem:[%s1721_s3 + $0x38] sm:$0xff]   ;;  %v1277_v10 = vld [vmem:[%s1721_s3 + $0x30] sm:$0xff]   ;;  %v1278_v11 = vld [vmem:[%s1721_s3 + $0x28] sm:$0xff]  }
 0x128   : > { %1146 = vmatprep.subr.bf16.mxu0 %v1276_v9  ;;  %1194 = vmatprep.subr.bf16.mxu1 %v1276_v9  ;;  %v1279_v12 = vld [vmem:[%s1721_s3 + $0x20] sm:$0xff]   ;;  %v542_v13 = vld [vmem:[#allocation2 + $0x30] sm:$0xff]  ;;  %v1280_v24 = vld [vmem:[%s1721_s3 + $0x18] sm:$0xff]  }
 0x129   : > { %1147 = vmatpush3.bf16.msra.mxu0 %v1276_v9  ;;  %1202 = vmatpush3.bf16.msra.mxu1 %v1276_v9  ;;  %v543_v14 = vld [vmem:[#allocation2] sm:$0xff]  ;;  %v1281_v29 = vld [vmem:[%s1721_s3 + $0x10] sm:$0xff]   ;;  %v1282_v30 = vld [vmem:[%s1721_s3 + $0x8] sm:$0xff]  }
 0x12a   : > { %1148 = vmatprep.subr.bf16.mxu0 %v1277_v10  ;;  %1195 = vmatprep.subr.bf16.mxu1 %v1277_v10  ;;  %v1541_v15 = vld [vmem:[%s1720_s2] ss:$0 sm:$0xff]  ;;  %v544_v31 = vld [vmem:[#allocation2 + $0x58] sm:$0xff]  ;;  %v552_v33 = vld [vmem:[#allocation2 + $0x10] sm:$0xff] }
 0x12b   : > { %v565_v16 = vadd.f32 %v1541_v15, %v542_v13  ;;  %v566_v17 = vadd.f32 %v1541_v15, %v543_v14  ;;  %v550_v18 = vld [vmem:[#allocation2 + $0x40] sm:$0xff]  ;;  %v545_v32 = vld [vmem:[#allocation2 + $0x18] sm:$0xff]  ;;  %v546_v35 = vld [vmem:[#allocation2 + $0x50] sm:$0xff]  ;;  %v567_v39 = vadd.f32 %v1541_v15, %v544_v31  ;;  %v575_v41 = vadd.f32 %v1541_v15, %v552_v33 }
 0x12c   : > { %v551_v19 = vld [vmem:[#allocation2 + $0x20] sm:$0xff]  ;;  %v573_v20 = vadd.f32 %v1541_v15, %v550_v18  ;;  %v553_v34 = vld [vmem:[#allocation2 + $0x38] sm:$0xff]  ;;  %v568_v40 = vadd.f32 %v1541_v15, %v545_v32  ;;  %v569_v43 = vadd.f32 %v1541_v15, %v546_v35  ;;  %v548_v52 = vld [vmem:[#allocation2 + $0x8] sm:$0xff] }
 0x12d   : > { %1149 = vmatpush3.bf16.msra.mxu0 %v1277_v10  ;;  %1203 = vmatpush3.bf16.msra.mxu1 %v1277_v10  ;;  %v574_v21 = vadd.f32 %v1541_v15, %v551_v19  ;;  %v581_v22 = vmax.f32 %v565_v16, 0.0  ;;  %v582_v23 = vmax.f32 %v566_v17, 0.0  ;;  %v547_v36 = vld [vmem:[#allocation2 + $0x68] sm:$0xff]  ;;  %v554_v37 = vld [vmem:[#allocation2 + $0x60] sm:$0xff]  ;;  %v555_v38 = vld [vmem:[#allocation2 + $0x70] sm:$0xff]  ;;  %v576_v42 = vadd.f32 %v1541_v15, %v553_v34 }
 0x12e   : > { %1150 = vmatprep.subr.bf16.mxu0 %v1278_v11  ;;  %1196 = vmatprep.subr.bf16.mxu1 %v1278_v11  ;;  %v589_v25 = vmax.f32 %v573_v20, 0.0  ;;  %v570_v44 = vadd.f32 %v1541_v15, %v547_v36  ;;  %v577_v45 = vadd.f32 %v1541_v15, %v554_v37  ;;  %v578_v46 = vadd.f32 %v1541_v15, %v555_v38  ;;  %v1283_v47 = vld [vmem:[%s1721_s3] sm:$0xff]   ;;  %v549_v53 = vld [vmem:[#allocation2 + $0x48] sm:$0xff]  ;;  %v556_v58 = vld [vmem:[#allocation2 + $0x78] sm:$0xff] }
 0x12f   : > { %v590_v26 = vmax.f32 %v574_v21, 0.0  ;;  %v597_v27 = vpack.c.bf16 %v582_v23, %v581_v22  ;;  %v583_v48 = vmax.f32 %v567_v39, 0.0  ;;  %v584_v49 = vmax.f32 %v568_v40, 0.0  ;;  %v557_v59 = vld [vmem:[#allocation2 + $0x28] sm:$0xff] }
 0x130   : > { %v591_v50 = vmax.f32 %v575_v41, 0.0  ;;  %v592_v51 = vmax.f32 %v576_v42, 0.0  ;;  %v585_v54 = vmax.f32 %v569_v43, 0.0  ;;  %v586_v55 = vmax.f32 %v570_v44, 0.0 }
 0x131   : > { %1151 = vmatpush3.bf16.msra.mxu0 %v1278_v11  ;;  %1204 = vmatpush3.bf16.msra.mxu1 %v1278_v11  ;;  %v601_v28 = vpack.c.bf16 %v590_v26, %v589_v25  ;;  %v593_v56 = vmax.f32 %v577_v45, 0.0  ;;  %v594_v57 = vmax.f32 %v578_v46, 0.0  ;;  %v598_v60 = vpack.c.bf16 %v584_v49, %v583_v48 }
 0x132   : > { %1152 = vmatprep.subr.bf16.mxu0 %v1279_v12  ;;  %1197 = vmatprep.subr.bf16.mxu1 %v1279_v12  ;;  %v571_v61 = vadd.f32 %v1541_v15, %v548_v52  ;;  %v602_v62 = vpack.c.bf16 %v592_v51, %v591_v50  ;;  %v572_v63 = vadd.f32 %v1541_v15, %v549_v53  ;;  %v773_v10 = vlaneseq }
 0x133   : > { %1162 = vmatprep.mubr.bf16.mxu0 %v597_v27  ;;  %1170 = vmatprep.mubr.bf16.mxu1 %v601_v28  ;;  %v579_v0 = vadd.f32 %v1541_v15, %v556_v58  ;;  %v580_v1 = vadd.f32 %v1541_v15, %v557_v59  ;;  %v599_v2 = vpack.c.bf16 %v586_v55, %v585_v54 }
 0x134   : > { %v603_v3 = vpack.c.bf16 %v594_v57, %v593_v56  ;;  %v587_v4 = vmax.f32 %v571_v61, 0.0  ;;  %v588_v5 = vmax.f32 %v572_v63, 0.0  ;;  %v1571_v11 = vand.u32 127, %v773_v10 }
 0x135   : > { %1153 = vmatpush3.bf16.msra.mxu0 %v1279_v12  ;;  %1205 = vmatpush3.bf16.msra.mxu1 %v1279_v12  ;;  %v595_v6 = vmax.f32 %v579_v0, 0.0  ;;  %v596_v7 = vmax.f32 %v580_v1, 0.0  ;;  %v1071_v12 = vld [vmem:[%s1722_s4] ss:$0 sm:$0xff] }
 0x136   : > { %1154 = vmatprep.subr.bf16.mxu0 %v1280_v24  ;;  %1198 = vmatprep.subr.bf16.mxu1 %v1280_v24  ;;  %v600_v8 = vpack.c.bf16 %v588_v5, %v587_v4  ;;  %vm775_vm0 = vcmp.lt.s32.totalorder %v1571_v11, 7 }
 0x137   : > { %v604_v9 = vpack.c.bf16 %v596_v7, %v595_v6 }
 0x139   : > { %1155 = vmatpush3.bf16.msra.mxu0 %v1280_v24  ;;  %1206 = vmatpush3.bf16.msra.mxu1 %v1280_v24 }
 0x13a   : > { %1156 = vmatprep.subr.bf16.mxu0 %v1281_v29  ;;  %1199 = vmatprep.subr.bf16.mxu1 %v1281_v29 }
 0x13d   : > { %1157 = vmatpush3.bf16.msra.mxu0 %v1281_v29  ;;  %1207 = vmatpush3.bf16.msra.mxu1 %v1281_v29 }
 0x13e   : > { %1158 = vmatprep.subr.bf16.mxu0 %v1282_v30  ;;  %1200 = vmatprep.subr.bf16.mxu1 %v1282_v30 }
 0x141   : > { %1159 = vmatpush3.bf16.msra.mxu0 %v1282_v30  ;;  %1208 = vmatpush3.bf16.msra.mxu1 %v1282_v30 }
 0x142   : > { %1160 = vmatprep.subr.bf16.mxu0 %v1283_v47  ;;  %1201 = vmatprep.subr.bf16.mxu1 %v1283_v47 }
 0x145   : > { %1161 = vmatpush3.bf16.msra.mxu0 %v1283_v47  ;;  %1209 = vmatpush3.bf16.msra.mxu1 %v1283_v47 }
 0x148   : > { %1163 = vmatmul.mubr.bf16.vlgmr.msra.gmra.mxu0 %v598_v60  ;;  %1171 = vmatmul.mubr.bf16.vlgmr.msra.gmra.mxu1 %v602_v62 }
 0x149   : > { %1166 = vmatprep.mubr.bf16.mxu0 %v599_v2  ;;  %1174 = vmatprep.mubr.bf16.mxu1 %v603_v3 }
 0x150   : > { %1167 = vmatmul.mubr.bf16.gmra.mxu0 %v600_v8  ;;  %1175 = vmatmul.mubr.bf16.gmra.mxu1 %v604_v9 }
 0x208   : > { %v1164_v13 = vpop.f32.mrf.mxu0  ;;  %v1172_v14 = vpop.f32.mrf.mxu1 }
 0x209   : > { %v719_v15 = vadd.f32 %v1164_v13, %v1071_v12  ;;  %v751_v16 = vadd.f32 %v1172_v14, %v1071_v12 }
 0x20a   : > { %v710_v17 = vpop.f32.mrf.mxu0  ;;  %v742_v18 = vpop.f32.mrf.mxu1 }
 0x20b   : > { %v711_v19 = vadd.f32 %v1071_v12, %v710_v17  ;;  %v786_v20 = vsel %vm775_vm0, %v751_v16, -1e+30  ;;  %v778_v21 = vsel %vm775_vm0, %v719_v15, -1e+30  ;;  %v743_v27 = vadd.f32 %v1071_v12, %v742_v18 }
 0x20c   : > { %812 = vmax.xlane.f32.xlu0 %v786_v20  ;;  %v1173_v22 = vpop.f32.mrf.mxu1  ;;  %796 = vmax.xlane.f32.xlu1 %v778_v21  ;;  %v1165_v23 = vpop.f32.mrf.mxu0 }
 0x20d   : > { %v722_v24 = vadd.f32 %v1165_v23, %v1071_v12  ;;  %v754_v28 = vadd.f32 %v1173_v22, %v1071_v12  ;;  %v776_v30 = vsel %vm775_vm0, %v711_v19, -1e+30  ;;  %v784_v37 = vsel %vm775_vm0, %v743_v27, -1e+30 }
 0x20e   : > { %v713_v25 = vpop.f32.mrf.mxu0  ;;  %v745_v26 = vpop.f32.mrf.mxu1 }
 0x20f   : > { %v779_v29 = vsel %vm775_vm0, %v722_v24, -1e+30  ;;  %v714_v34 = vadd.f32 %v1071_v12, %v713_v25  ;;  %v746_v35 = vadd.f32 %v1071_v12, %v745_v26  ;;  %v787_v36 = vsel %vm775_vm0, %v754_v28, -1e+30 }
 0x210   : > { %798 = vmax.xlane.f32.xlu1 %v779_v29  ;;  %792 = vmax.xlane.f32.xlu0 %v776_v30  ;;  %v1168_v31 = vpop.f32.mrf.mxu0  ;;  %v1176_v32 = vpop.f32.mrf.mxu1 }
 0x211   : > { %v735_v40 = vadd.f32 %v1168_v31, %v1071_v12  ;;  %v785_v42 = vsel %vm775_vm0, %v746_v35, -1e+30  ;;  %v777_v43 = vsel %vm775_vm0, %v714_v34, -1e+30  ;;  %v767_v55 = vadd.f32 %v1176_v32, %v1071_v12 }
 0x212   : > { %v726_v33 = vpop.f32.mrf.mxu0  ;;  %v758_v39 = vpop.f32.mrf.mxu1 }
 0x213   : > { %v782_v47 = vsel %vm775_vm0, %v735_v40, -1e+30  ;;  %v727_v48 = vadd.f32 %v1071_v12, %v726_v33  ;;  %v759_v51 = vadd.f32 %v1071_v12, %v758_v39  ;;  %v1611_v60 = vsel %vm775_vm0, %v767_v55, -1e+30 }
 0x214   : > { %814 = vmax.xlane.f32.xlu1 %v787_v36  ;;  %808 = vmax.xlane.f32.xlu0 %v784_v37  ;;  %v1169_v38 = vpop.f32.mrf.mxu0  ;;  %v1177_v45 = vpop.f32.mrf.mxu1 }
 0x215   : > { %v738_v41 = vadd.f32 %v1169_v38, %v1071_v12  ;;  %v780_v54 = vsel %vm775_vm0, %v727_v48, -1e+30  ;;  %v770_v56 = vadd.f32 %v1177_v45, %v1071_v12  ;;  %v788_v58 = vsel %vm775_vm0, %v759_v51, -1e+30 }
 0x216   : > { %v729_v44 = vpop.f32.mrf.mxu0  ;;  %v761_v50 = vpop.f32.mrf.mxu1 }
 0x217   : > { %v783_v46 = vsel %vm775_vm0, %v738_v41, -1e+30  ;;  %v730_v49 = vadd.f32 %v1071_v12, %v729_v44  ;;  %v762_v52 = vadd.f32 %v1071_v12, %v761_v50  ;;  %v1607_v59 = vsel %vm775_vm0, %v770_v56, -1e+30 }
 0x218   : > { %810 = vmax.xlane.f32.xlu1 %v785_v42  ;;  %794 = vmax.xlane.f32.xlu0 %v777_v43 }
 0x219   : > { %v781_v53 = vsel %vm775_vm0, %v730_v49, -1e+30  ;;  %v789_v57 = vsel %vm775_vm0, %v762_v52, -1e+30 }
 0x21c   : > { %806 = vmax.xlane.f32.xlu1 %v783_v46  ;;  %804 = vmax.xlane.f32.xlu0 %v782_v47 }
 0x220   : > { %802 = vmax.xlane.f32.xlu1 %v781_v53  ;;  %800 = vmax.xlane.f32.xlu0 %v780_v54 }
 0x224   : > { %818 = vmax.xlane.f32.xlu1 %v789_v57  ;;  %816 = vmax.xlane.f32.xlu0 %v788_v58 }
 0x228   : > { %822 = vmax.xlane.f32.xlu1 %v1607_v59  ;;  %820 = vmax.xlane.f32.xlu0 %v1611_v60 }
 0x295   : > { %v813_v61 = vpop.xlane.xlu0 %812  ;;  %v797_v62 = vpop.xlane.xlu1 %796 }
 0x296   : > { %v1615_v63 = vsub.f32 %v778_v21, %v797_v62  ;;  %v1617_v0 = vsub.f32 %v786_v20, %v813_v61 }
 0x298   : > { %v844_v1 = vmul.f32 1.442695, %v1615_v63  ;;  %v860_v5 = vmul.f32 1.442695, %v1617_v0 }
 0x299   : > { %v799_v2 = vpop.xlane.xlu1 %798  ;;  %v793_v3 = vpop.xlane.xlu0 %792 }
 0x29a   : > { %v1620_v4 = vsub.f32 %v779_v29, %v799_v2  ;;  %1284 = vpow2.f32 %v844_v1  ;;  %v1623_v6 = vsub.f32 %v776_v30, %v793_v3 }
 0x29c   : > { %v846_v7 = vmul.f32 1.442695, %v1620_v4  ;;  %v840_v12 = vmul.f32 1.442695, %v1623_v6 }
 0x29d   : > { %v815_v8 = vpop.xlane.xlu1 %814  ;;  %v809_v9 = vpop.xlane.xlu0 %808 }
 0x29e   : > { %1286 = vpow2.f32 %v846_v7  ;;  %v1626_v10 = vsub.f32 %v787_v36, %v815_v8  ;;  %v1628_v11 = vsub.f32 %v784_v37, %v809_v9 }
 0x29f   : > { %1288 = vpow2.f32 %v860_v5 }
 0x2a0   : > { %v862_v13 = vmul.f32 1.442695, %v1626_v10  ;;  %v856_v16 = vmul.f32 1.442695, %v1628_v11 }
 0x2a1   : > { %v811_v14 = vpop.xlane.xlu1 %810  ;;  %v795_v15 = vpop.xlane.xlu0 %794 }
 0x2a2   : > { %1290 = vpow2.f32 %v862_v13  ;;  %v1633_v17 = vsub.f32 %v785_v42, %v811_v14  ;;  %v1635_v18 = vsub.f32 %v777_v43, %v795_v15 }
 0x2a3   : > { %1292 = vpow2.f32 %v840_v12 }
 0x2a4   : > { %v842_v19 = vmul.f32 1.442695, %v1635_v18  ;;  %1294 = vpow2.f32 %v856_v16  ;;  %v858_v22 = vmul.f32 1.442695, %v1633_v17 }
 0x2a5   : > { %v807_v20 = vpop.xlane.xlu1 %806  ;;  %v805_v21 = vpop.xlane.xlu0 %804 }
 0x2a6   : > { %v1639_v23 = vsub.f32 %v783_v46, %v807_v20  ;;  %v1641_v24 = vsub.f32 %v782_v47, %v805_v21  ;;  %1296 = vpow2.f32 %v842_v19 }
 0x2a7   : > { %v1285_v25 = vpop.eup %1284  ;;  %1298 = vpow2.f32 %v858_v22 }
 0x2a8   : > { %v852_v26 = vmul.f32 1.442695, %v1641_v24  ;;  %876 = vadd.xlane.f32.xlu0 %v1285_v25  ;;  %v854_v29 = vmul.f32 1.442695, %v1639_v23 }
 0x2a9   : > { %v803_v27 = vpop.xlane.xlu1 %802  ;;  %v801_v28 = vpop.xlane.xlu0 %800 }
 0x2aa   : > { %v1645_v30 = vsub.f32 %v781_v53, %v803_v27  ;;  %v1647_v31 = vsub.f32 %v780_v54, %v801_v28  ;;  %1300 = vpow2.f32 %v852_v26 }
 0x2ab   : > { %v1287_v32 = vpop.eup %1286  ;;  %1302 = vpow2.f32 %v854_v29 }
 0x2ac   : > { %v1289_v33 = vpop.eup %1288  ;;  %v848_v34 = vmul.f32 1.442695, %v1647_v31  ;;  %878 = vadd.xlane.f32.xlu1 %v1287_v32  ;;  %v850_v37 = vmul.f32 1.442695, %v1645_v30 }
 0x2ad   : > { %892 = vadd.xlane.f32.xlu0 %v1289_v33  ;;  %v819_v35 = vpop.xlane.xlu1 %818  ;;  %v817_v36 = vpop.xlane.xlu0 %816 }
 0x2ae   : > { %v1651_v38 = vsub.f32 %v789_v57, %v819_v35  ;;  %v1653_v39 = vsub.f32 %v788_v58, %v817_v36  ;;  %1304 = vpow2.f32 %v848_v34 }
 0x2af   : > { %v1291_v40 = vpop.eup %1290  ;;  %1306 = vpow2.f32 %v850_v37 }
 0x2b0   : > { %v1293_v41 = vpop.eup %1292  ;;  %v864_v42 = vmul.f32 1.442695, %v1653_v39  ;;  %894 = vadd.xlane.f32.xlu1 %v1291_v40  ;;  %v866_v45 = vmul.f32 1.442695, %v1651_v38 }
 0x2b1   : > { %872 = vadd.xlane.f32.xlu0 %v1293_v41  ;;  %v823_v43 = vpop.xlane.xlu1 %822  ;;  %v821_v44 = vpop.xlane.xlu0 %820 }
 0x2b2   : > { %v1658_v46 = vsub.f32 %v1611_v60, %v821_v44  ;;  %v1295_v47 = vpop.eup %1294  ;;  %1308 = vpow2.f32 %v864_v42  ;;  %v1661_v48 = vsub.f32 %v1607_v59, %v823_v43 }
 0x2b3   : > { %v1297_v49 = vpop.eup %1296  ;;  %1310 = vpow2.f32 %v866_v45 }
 0x2b4   : > { %v868_v50 = vmul.f32 1.442695, %v1658_v46  ;;  %874 = vadd.xlane.f32.xlu1 %v1297_v49  ;;  %v1299_v51 = vpop.eup %1298  ;;  %v870_v52 = vmul.f32 1.442695, %v1661_v48 }
 0x2b5   : > { %888 = vadd.xlane.f32.xlu0 %v1295_v47 }
 0x2b6   : > { %1312 = vpow2.f32 %v868_v50 }
 0x2b7   : > { %v1301_v53 = vpop.eup %1300  ;;  %1314 = vpow2.f32 %v870_v52 }
 0x2b8   : > { %890 = vadd.xlane.f32.xlu1 %v1299_v51  ;;  %v1303_v54 = vpop.eup %1302 }
 0x2b9   : > { %884 = vadd.xlane.f32.xlu0 %v1301_v53 }
 0x2bb   : > { %v1305_v55 = vpop.eup %1304 }
 0x2bc   : > { %886 = vadd.xlane.f32.xlu1 %v1303_v54  ;;  %v1307_v56 = vpop.eup %1306 }
 0x2bd   : > { %880 = vadd.xlane.f32.xlu0 %v1305_v55 }
 0x2bf   : > { %v1309_v57 = vpop.eup %1308 }
 0x2c0   : > { %882 = vadd.xlane.f32.xlu1 %v1307_v56  ;;  %v1311_v58 = vpop.eup %1310 }
 0x2c1   : > { %896 = vadd.xlane.f32.xlu0 %v1309_v57 }
 0x2c3   : > { %v1313_v59 = vpop.eup %1312 }
 0x2c4   : > { %898 = vadd.xlane.f32.xlu1 %v1311_v58  ;;  %v1315_v60 = vpop.eup %1314 }
 0x2c5   : > { %900 = vadd.xlane.f32.xlu0 %v1313_v59 }
 0x2c8   : > { %902 = vadd.xlane.f32.xlu1 %v1315_v60 }
 0x331   : > { %v877_v61 = vpop.xlane.xlu0 %876 }
 0x332   : > { %1316 = vlog2.f32 %v877_v61 }
 0x335   : > { %v879_v62 = vpop.xlane.xlu1 %878 }
 0x336   : > { %1318 = vlog2.f32 %v879_v62  ;;  %v893_v1 = vpop.xlane.xlu0 %892 }
 0x337   : > { %1320 = vlog2.f32 %v893_v1 }
 0x339   : > { %v895_v2 = vpop.xlane.xlu1 %894 }
 0x33a   : > { %1322 = vlog2.f32 %v895_v2  ;;  %v873_v3 = vpop.xlane.xlu0 %872 }
 0x33b   : > { %1324 = vlog2.f32 %v873_v3 }
 0x33d   : > { %v875_v5 = vpop.xlane.xlu1 %874 }
 0x33e   : > { %v889_v7 = vpop.xlane.xlu0 %888  ;;  %1326 = vlog2.f32 %v875_v5 }
 0x33f   : > { %v1317_v8 = vpop.eup %1316  ;;  %1328 = vlog2.f32 %v889_v7 }
 0x340   : > { %v909_v9 = vmul.f32 0.6931472, %v1317_v8 }
 0x341   : > { %v891_v12 = vpop.xlane.xlu1 %890 }
 0x342   : > { %v885_v13 = vpop.xlane.xlu0 %884  ;;  %v938_v15 = vsub.f32 %v1615_v63, %v909_v9  ;;  %1330 = vlog2.f32 %v891_v12 }
 0x343   : > { %v1319_v14 = vpop.eup %1318  ;;  %1332 = vlog2.f32 %v885_v13 }
 0x344   : > { %v1321_v16 = vpop.eup %1320  ;;  %v911_v19 = vmul.f32 0.6931472, %v1319_v14  ;;  %954 = vst [vmem:[%s1502_s7 + $0x10] sm:$0xff] %v938_v15 }
 0x345   : > { %v925_v20 = vmul.f32 0.6931472, %v1321_v16  ;;  %v887_v22 = vpop.xlane.xlu1 %886 }
 0x346   : > { %v939_v21 = vsub.f32 %v1620_v4, %v911_v19  ;;  %v881_v25 = vpop.xlane.xlu0 %880  ;;  %1334 = vlog2.f32 %v887_v22 }
 0x347   : > { %v1323_v26 = vpop.eup %1322  ;;  %v946_v27 = vsub.f32 %v1617_v0, %v925_v20  ;;  %1336 = vlog2.f32 %v881_v25 }
 0x348   : > { %v1325_v28 = vpop.eup %1324  ;;  %955 = vst [vmem:[%s1502_s7 + $0x18] sm:$0xff] %v939_v21  ;;  %v927_v63 = vmul.f32 0.6931472, %v1323_v26 }
 0x349   : > { %962 = vst [vmem:[%s1502_s7 + $0x50] sm:$0xff] %v946_v27  ;;  %v905_v29 = vmul.f32 0.6931472, %v1325_v28  ;;  %v883_v33 = vpop.xlane.xlu1 %882 }
 0x34a   : > { %v947_v32 = vsub.f32 %v1626_v10, %v927_v63  ;;  %v897_v34 = vpop.xlane.xlu0 %896  ;;  %1338 = vlog2.f32 %v883_v33 }
 0x34b   : > { %v936_v4 = vsub.f32 %v1623_v6, %v905_v29  ;;  %v1327_v35 = vpop.eup %1326  ;;  %1340 = vlog2.f32 %v897_v34 }
 0x34c   : > { %963 = vst [vmem:[%s1502_s7 + $0x58] sm:$0xff] %v947_v32  ;;  %v1329_v0 = vpop.eup %1328  ;;  %v907_v36 = vmul.f32 0.6931472, %v1327_v35 }
 0x34d   : > { %952 = vst [vmem:[%s1502_s7] sm:$0xff] %v936_v4  ;;  %v921_v37 = vmul.f32 0.6931472, %v1329_v0  ;;  %v899_v40 = vpop.xlane.xlu1 %898 }
 0x34e   : > { %v901_v41 = vpop.xlane.xlu0 %900  ;;  %v937_v42 = vsub.f32 %v1635_v18, %v907_v36  ;;  %1342 = vlog2.f32 %v899_v40 }
 0x34f   : > { %v1331_v10 = vpop.eup %1330  ;;  %v944_v6 = vsub.f32 %v1628_v11, %v921_v37  ;;  %1344 = vlog2.f32 %v901_v41 }
 0x350   : > { %v1333_v43 = vpop.eup %1332  ;;  %953 = vst [vmem:[%s1502_s7 + $0x8] sm:$0xff] %v937_v42  ;;  %v923_v44 = vmul.f32 0.6931472, %v1331_v10 }
 0x351   : > { %960 = vst [vmem:[%s1502_s7 + $0x40] sm:$0xff] %v944_v6  ;;  %v917_v45 = vmul.f32 0.6931472, %v1333_v43  ;;  %v903_v47 = vpop.xlane.xlu1 %902 }
 0x352   : > { %v945_v49 = vsub.f32 %v1633_v17, %v923_v44  ;;  %1346 = vlog2.f32 %v903_v47 }
 0x353   : > { %v1335_v50 = vpop.eup %1334  ;;  %v942_v18 = vsub.f32 %v1641_v24, %v917_v45 }
 0x354   : > { %v1337_v51 = vpop.eup %1336  ;;  %961 = vst [vmem:[%s1502_s7 + $0x48] sm:$0xff] %v945_v49  ;;  %v919_v52 = vmul.f32 0.6931472, %v1335_v50 }
 0x355   : > { %958 = vst [vmem:[%s1502_s7 + $0x30] sm:$0xff] %v942_v18  ;;  %v913_v11 = vmul.f32 0.6931472, %v1337_v51 }
 0x356   : > { %v943_v53 = vsub.f32 %v1639_v23, %v919_v52 }
 0x357   : > { %v1339_v54 = vpop.eup %1338  ;;  %v940_v55 = vsub.f32 %v1647_v31, %v913_v11 }
 0x358   : > { %v1341_v56 = vpop.eup %1340  ;;  %959 = vst [vmem:[%s1502_s7 + $0x38] sm:$0xff] %v943_v53  ;;  %v915_v17 = vmul.f32 0.6931472, %v1339_v54 }
 0x359   : > { %956 = vst [vmem:[%s1502_s7 + $0x20] sm:$0xff] %v940_v55  ;;  %v929_v57 = vmul.f32 0.6931472, %v1341_v56 }
 0x35a   : > { %v941_v24 = vsub.f32 %v1645_v30, %v915_v17 }
 0x35b   : > { %v1343_v58 = vpop.eup %1342  ;;  %v948_v59 = vsub.f32 %v1653_v39, %v929_v57 }
 0x35c   : > { %v1345_v60 = vpop.eup %1344  ;;  %957 = vst [vmem:[%s1502_s7 + $0x28] sm:$0xff] %v941_v24  ;;  %v931_v61 = vmul.f32 0.6931472, %v1343_v58 }
 0x35d   : > { %964 = vst [vmem:[%s1502_s7 + $0x60] sm:$0xff] %v948_v59  ;;  %v933_v23 = vmul.f32 0.6931472, %v1345_v60 }
 0x35e   : > { %v949_v31 = vsub.f32 %v1651_v38, %v931_v61 }
 0x35f   : > { %v1347_v62 = vpop.eup %1346  ;;  %v950_v1 = vsub.f32 %v1658_v46, %v933_v23 }
 0x360   : > { %965 = vst [vmem:[%s1502_s7 + $0x68] sm:$0xff] %v949_v31  ;;  %v935_v2 = vmul.f32 0.6931472, %v1347_v62 }
 0x361   : > { %966 = vst [vmem:[%s1502_s7 + $0x70] sm:$0xff] %v950_v1 }
 0x362   : > { %v951_v3 = vsub.f32 %v1661_v48, %v935_v2 }
 0x364   : > { %967 = vst [vmem:[%s1502_s7 + $0x78] sm:$0xff] %v951_v3 }
 0x365 PF: > { %s15_s24 = sadd.s32 1, %s1402_s24   ;;  %s1724_s18 = smov %s1382_s19 }
 0x366   : > { %p12_p13 = scmp.ge.s32.totalorder %s15_s24, 27   ;;  %s1725_s19 = smov %s1486_s6 }
 0x367   : > { %s1726_s20 = smov %s1394_s22  ;;  %s1727_s21 = smov %s1398_s23 }
 0x368   : > { %s1728_s22 = smov %s1731_s25  ;;  %s1729_s23 = smov %s1735_s26 }
 0x369   :  { %14 = sbr.rel (!%p12_p13) target bundleno = 4 (0x4), region = 122 }

</bundles_post_ra>
